<compile_context>
chip_gen: v7x
topology: tpu7x:2x2x1
jax: 0.10.0
libtpu: 0.0.40
codegen_flags: <defaults>
</compile_context>

<pallas_src>
import functools
import numpy as np
import jax
import jax.numpy as jnp
from jax.experimental import pallas as pl
from jax.experimental.pallas import tpu as pltpu

_EPS = 1e-5


def _round_up(v, m):
    return (v + m - 1) // m * m


def _conv_block_kernel(x_ref, mask_ref, w1_ref, g1_ref, be1_ref,
                       w2_ref, g2_ref, be2_ref, o_ref, *, wp, n_valid):
    """Fused conv->BN->ReLU->conv->BN->ReLU, channel-major, single grid point.

    x_ref   : (C1, L_EXT) bf16  channel-major flattened zero-padded input with a
                                PRE = wp+1 zero halo on both lane ends
    mask_ref: (1, L)      f32   1.0 at valid (non-padding) flattened positions
    w*_ref  : (3, C2, 3*C) bf16 conv weights, 3x3 taps folded in groups of 3
    g*/be*  : (C2, 1)     f32   BatchNorm gamma / beta
    o_ref   : (C2, L)     f32   lane-dense output on the padded grid (wrapper
                                slices the interior and restores NCHW)
    """
    C2, L = o_ref.shape
    PRE = wp + 1

    mask = mask_ref[...]                                     # (1, L)
    inv_cnt = 1.0 / float(n_valid)

    # Tap offsets in flattened padded coordinates (dh-major, dw-minor); must
    # match the (3, C2, 3*C) weight layout prepared by the wrapper.
    offs = [(dh - 1) * wp + (dw - 1) for dh in range(3) for dw in range(3)]

    def conv3x3(src_ext, w_ref):
        # src_ext: (C, L_EXT) bf16 with zero halos, so every tap is a constant
        # lane shift of the same flattened array.  Fold taps in groups of 3:
        # three K=3*C bf16 matmuls accumulated in f32.
        C = src_ext.shape[0]
        acc = None
        for g in range(3):
            taps = [src_ext[:, PRE + offs[3 * g + t]: PRE + offs[3 * g + t] + L]
                    for t in range(3)]
            patches = jnp.concatenate(taps, axis=0)          # (3*C, L) bf16
            part = jnp.dot(w_ref[g], patches,
                           preferred_element_type=jnp.float32)
            acc = part if acc is None else acc + part
        return acc                                           # (C2, L) f32

    def bn_relu(acc, g_ref, be_ref):
        # Training-mode BatchNorm over the N*H*W valid positions, single pass:
        # masked sum & sum-of-squares, var = E[x^2] - mean^2 (clamped at 0).
        am = acc * mask
        mean = jnp.sum(am, axis=1, keepdims=True) * inv_cnt
        ex2 = jnp.sum(am * acc, axis=1, keepdims=True) * inv_cnt
        var = jnp.maximum(ex2 - mean * mean, 0.0)
        y = (acc - mean) * jax.lax.rsqrt(var + _EPS) * g_ref[...] + be_ref[...]
        return jnp.maximum(y, 0.0)

    # ---- conv1 -> BN1 -> ReLU (conv bias cancels under training-mode BN) ----
    a1 = conv3x3(x_ref[...], w1_ref)                          # (C2, L) f32
    y1 = bn_relu(a1, g1_ref, be1_ref) * mask                  # halo -> 0 = conv2 padding

    # ---- conv2 -> BN2 -> ReLU ----
    zpre = jnp.zeros((C2, PRE), jnp.bfloat16)
    y1_ext = jnp.concatenate([zpre, y1.astype(jnp.bfloat16), zpre], axis=1)
    a2 = conv3x3(y1_ext, w2_ref)                              # (C2, L) f32
    o_ref[...] = bn_relu(a2, g2_ref, be2_ref)                 # lane-dense store


def init_params(key, in_channels, out_channels):
    """Synthetic parameters mirroring the PyTorch module: OIHW conv weights with
    U(-1/sqrt(fan_in), 1/sqrt(fan_in)) init, BN gamma=1 / beta=0.  Conv biases
    are created for fidelity but are mathematically redundant in front of a
    training-mode BatchNorm (they cancel), so the kernel never sees them."""
    k1, k2, k3, k4 = jax.random.split(key, 4)
    lim1 = 1.0 / float(np.sqrt(in_channels * 9))
    lim2 = 1.0 / float(np.sqrt(out_channels * 9))
    return dict(
        w1=jax.random.uniform(k1, (out_channels, in_channels, 3, 3),
                              jnp.float32, -lim1, lim1),
        b1=jax.random.uniform(k2, (out_channels,), jnp.float32, -lim1, lim1),
        g1=jnp.ones((out_channels,), jnp.float32),
        be1=jnp.zeros((out_channels,), jnp.float32),
        w2=jax.random.uniform(k3, (out_channels, out_channels, 3, 3),
                              jnp.float32, -lim2, lim2),
        b2=jax.random.uniform(k4, (out_channels,), jnp.float32, -lim2, lim2),
        g2=jnp.ones((out_channels,), jnp.float32),
        be2=jnp.zeros((out_channels,), jnp.float32),
    )


@jax.jit
def conv_block(x_nchw, params):
    """x_nchw: (N, Cin, H, W) float32 -> (N, Cout, H, W) float32."""
    x = x_nchw.astype(jnp.float32)
    N, Cin, H, W = x.shape
    Cout = params["w1"].shape[0]
    Hp, Wp = H + 2, W + 2
    L = N * Hp * Wp
    PRE = Wp + 1
    L_EXT = 2 * PRE + L

    # Pad channels to multiples of 16 so bf16 sublane packing (16 rows / vreg)
    # stays tile-aligned for every matmul operand (zero fill -> no effect).
    C1 = _round_up(Cin, 16)
    C2 = _round_up(Cout, 16)

    # ---- wrapper-side layout plumbing (fused XLA copies over HBM) -----------
    # NCHW -> zero-pad channels + bottom/right spatial halo -> channel-major
    # flattened (C1, L) -> PRE zero halo on both lane ends -> bf16.
    xp = jnp.pad(x, ((0, 0), (0, C1 - Cin), (0, 2), (0, 2)))         # (N,C1,Hp,Wp)
    xcm = jnp.transpose(xp, (1, 0, 2, 3)).reshape(C1, L)
    x_ext = jnp.pad(xcm, ((0, 0), (PRE, PRE))).astype(jnp.bfloat16)  # (C1, L_EXT)

    def fold_taps(w, ci, ci_p, co_p):
        # OIHW (co,ci,kh,kw) -> (3 groups=kh, co_p, 3*ci_p) bf16,
        # K index within a group = kw*ci_p + ci (matches in-kernel tap concat).
        w = jnp.pad(w, ((0, co_p - w.shape[0]), (0, ci_p - ci), (0, 0), (0, 0)))
        w = jnp.transpose(w, (0, 2, 3, 1)).reshape(co_p, 3, 3 * ci_p)
        return jnp.transpose(w, (1, 0, 2)).astype(jnp.bfloat16)

    w1g = fold_taps(params["w1"], Cin, C1, C2)
    w2g = fold_taps(params["w2"], Cout, C2, C2)

    def bn_param(p):
        return jnp.pad(p, (0, C2 - Cout)).reshape(C2, 1).astype(jnp.float32)

    g1, be1 = bn_param(params["g1"]), bn_param(params["be1"])
    g2, be2 = bn_param(params["g2"]), bn_param(params["be2"])

    # Static validity mask of the flattened padded grid (trace-time constant).
    # Kept as one tiny (1, L) input DMA for lowering robustness.
    m = np.zeros((N, Hp, Wp), np.float32)
    m[:, :H, :W] = 1.0
    mask = jnp.asarray(m.reshape(1, L))

    # VMEM limit derived from the actual resident working set (+ headroom),
    # instead of a hard-coded 16 MiB; capped well under v7x's 64 MiB physical.
    est = (C1 * L_EXT * 2 + L * 4                     # x_ext + mask
           + 9 * (C1 + C2) * C2 * 2 + 4 * C2 * 4      # weights + BN params
           + 2 * 3 * max(C1, C2) * L * 2              # live im2col groups (bf16)
           + 6 * C2 * L * 4                           # acc/a1/y1/a2/out temps (f32)
           + C2 * L_EXT * 2                           # y1_ext (bf16)
           + 2 * C2 * L * 4)                          # double-buffered output block
    vmem_bytes = int(min(max(2 * est + (2 << 20), 24 << 20), 56 << 20))

    flops = 2 * L * (9 * C1) * C2 + 2 * L * (9 * C2) * C2
    bytes_accessed = int(2 * x_ext.size + 4 * mask.size
                         + 2 * (w1g.size + w2g.size) + 16 * C2 + 4 * C2 * L)

    kernel = functools.partial(_conv_block_kernel, wp=Wp, n_valid=N * H * W)

    # TODO(synk): for production shapes, tile over N / H-strips with a real grid
    # (two-phase BatchNorm: sum/sumsq accumulators finalized with pl.when) and
    # mark the tile axis "parallel" so both v7x TensorCores are used; the
    # single-grid-point, whole-array-VMEM form here is sized for toy shapes.
    out = pl.pallas_call(
        kernel,
        out_shape=jax.ShapeDtypeStruct((C2, L), jnp.float32),
        in_specs=[pl.BlockSpec(memory_space=pltpu.MemorySpace.VMEM)] * 8,
        out_specs=pl.BlockSpec(memory_space=pltpu.MemorySpace.VMEM),
        compiler_params=pltpu.CompilerParams(vmem_limit_bytes=vmem_bytes),
        cost_estimate=pl.CostEstimate(flops=flops, transcendentals=2 * C2,
                                      bytes_accessed=bytes_accessed),
    )(x_ext, mask, w1g, g1, be1, w2g, g2, be2)

    # Wrapper-side interior extraction: padded-grid lane layout -> NCHW
    # (one strided XLA copy; also drops the channel-alignment padding).
    y = out.reshape(C2, N, Hp, Wp).transpose(1, 0, 2, 3)
    return y[:, :Cout, :H, :W]


def _reference(x, params):
    """Plain-JAX reference of the PyTorch block (training-mode BatchNorm)."""
    def conv(h, w, b):
        y = jax.lax.conv_general_dilated(
            h, w, window_strides=(1, 1), padding=((1, 1), (1, 1)),
            dimension_numbers=("NCHW", "OIHW", "NCHW"),
            precision=jax.lax.Precision.HIGHEST)
        return y + b[None, :, None, None]

    def bn_relu(y, g, be):
        mu = jnp.mean(y, axis=(0, 2, 3), keepdims=True)
        var = jnp.mean((y - mu) ** 2, axis=(0, 2, 3), keepdims=True)
        yn = (y - mu) * jax.lax.rsqrt(var + _EPS)
        yn = yn * g[None, :, None, None] + be[None, :, None, None]
        return jnp.maximum(yn, 0.0)

    y = bn_relu(conv(x, params["w1"], params["b1"]), params["g1"], params["be1"])
    return bn_relu(conv(y, params["w2"], params["b2"]), params["g2"], params["be2"])


if __name__ == "__main__":
    key = jax.random.PRNGKey(0)
    kx, kp = jax.random.split(key)

    batch, in_channels, out_channels, spatial = 2, 4, 8, 16
    x = jax.random.normal(kx, (batch, in_channels, spatial, spatial), jnp.float32)
    params = init_params(kp, in_channels, out_channels)

    y = conv_block(x, params)
    jax.block_until_ready(y)
    assert y.shape == (batch, out_channels, spatial, spatial)

    # sanity check against a plain-JAX f32 reference; tolerance sized for the
    # bf16 MXU operands (all BN/ReLU math stays f32).
    y_ref = _reference(x, params)
    err = float(jnp.max(jnp.abs(y - y_ref)))
    assert err < 5e-2, f"mismatch vs reference: max abs err = {err}"

    print("KERNEL_OK")
</pallas_src>

<mosaic_0001>
module attributes {stable_mosaic.version = 11 : i64} {
  func.func @_conv_block_kernel(%arg0: memref<16x686xbf16, #tpu.memory_space<vmem>>, %arg1: memref<1x648xf32, #tpu.memory_space<vmem>>, %arg2: memref<3x16x48xbf16, #tpu.memory_space<vmem>>, %arg3: memref<16x1xf32, #tpu.memory_space<vmem>>, %arg4: memref<16x1xf32, #tpu.memory_space<vmem>>, %arg5: memref<3x16x48xbf16, #tpu.memory_space<vmem>>, %arg6: memref<16x1xf32, #tpu.memory_space<vmem>>, %arg7: memref<16x1xf32, #tpu.memory_space<vmem>>, %arg8: memref<16x648xf32, #tpu.memory_space<vmem>>) attributes {dimension_semantics = [], scalar_prefetch = 0 : i64, scratch_operands = 0 : i64, tpu.core_type = #tpu.core_type<tc>} {
    %c0 = arith.constant 0 : index
    %c0_0 = arith.constant 0 : index
    %0 = vector.load %arg1[%c0, %c0_0] : memref<1x648xf32, #tpu.memory_space<vmem>>, vector<1x648xf32>
    %c0_1 = arith.constant 0 : index
    %c0_2 = arith.constant 0 : index
    %1 = vector.load %arg0[%c0_1, %c0_2] : memref<16x686xbf16, #tpu.memory_space<vmem>>, vector<16x686xbf16>
    %2 = vector.extract_strided_slice %1 {offsets = [0, 0], sizes = [16, 648], strides = [1, 1]} : vector<16x686xbf16> to vector<16x648xbf16>
    %3 = vector.extract_strided_slice %1 {offsets = [0, 1], sizes = [16, 648], strides = [1, 1]} : vector<16x686xbf16> to vector<16x648xbf16>
    %4 = vector.extract_strided_slice %1 {offsets = [0, 2], sizes = [16, 648], strides = [1, 1]} : vector<16x686xbf16> to vector<16x648xbf16>
    %5 = tpu.concatenate %2, %3, %4 in 0 : vector<16x648xbf16>, vector<16x648xbf16>, vector<16x648xbf16> -> vector<48x648xbf16>
    %c0_3 = arith.constant 0 : index
    %c0_4 = arith.constant 0 : index
    %c0_5 = arith.constant 0 : index
    %6 = vector.load %arg2[%c0_3, %c0_4, %c0_5] : memref<3x16x48xbf16, #tpu.memory_space<vmem>>, vector<1x16x48xbf16>
    %7 = vector.shape_cast %6 : vector<1x16x48xbf16> to vector<16x48xbf16>
    %cst = arith.constant dense<0.000000e+00> : vector<16x648xf32>
    %8 = tpu.matmul %7, %5, %cst {dimension_numbers = #tpu.dot_dimension_numbers<[1], [0], [0], [1], [0, 0, 1, 1], [], []>} : vector<16x48xbf16>, vector<48x648xbf16>, vector<16x648xf32> -> vector<16x648xf32>
    %9 = vector.extract_strided_slice %1 {offsets = [0, 18], sizes = [16, 648], strides = [1, 1]} : vector<16x686xbf16> to vector<16x648xbf16>
    %10 = vector.extract_strided_slice %1 {offsets = [0, 19], sizes = [16, 648], strides = [1, 1]} : vector<16x686xbf16> to vector<16x648xbf16>
    %11 = vector.extract_strided_slice %1 {offsets = [0, 20], sizes = [16, 648], strides = [1, 1]} : vector<16x686xbf16> to vector<16x648xbf16>
    %12 = tpu.concatenate %9, %10, %11 in 0 : vector<16x648xbf16>, vector<16x648xbf16>, vector<16x648xbf16> -> vector<48x648xbf16>
    %c1 = arith.constant 1 : index
    %c0_6 = arith.constant 0 : index
    %c0_7 = arith.constant 0 : index
    %13 = vector.load %arg2[%c1, %c0_6, %c0_7] : memref<3x16x48xbf16, #tpu.memory_space<vmem>>, vector<1x16x48xbf16>
    %14 = vector.shape_cast %13 : vector<1x16x48xbf16> to vector<16x48xbf16>
    %cst_8 = arith.constant dense<0.000000e+00> : vector<16x648xf32>
    %15 = tpu.matmul %14, %12, %cst_8 {dimension_numbers = #tpu.dot_dimension_numbers<[1], [0], [0], [1], [0, 0, 1, 1], [], []>} : vector<16x48xbf16>, vector<48x648xbf16>, vector<16x648xf32> -> vector<16x648xf32>
    %16 = arith.addf %8, %15 : vector<16x648xf32>
    %17 = vector.extract_strided_slice %1 {offsets = [0, 36], sizes = [16, 648], strides = [1, 1]} : vector<16x686xbf16> to vector<16x648xbf16>
    %18 = vector.extract_strided_slice %1 {offsets = [0, 37], sizes = [16, 648], strides = [1, 1]} : vector<16x686xbf16> to vector<16x648xbf16>
    %19 = vector.extract_strided_slice %1 {offsets = [0, 38], sizes = [16, 648], strides = [1, 1]} : vector<16x686xbf16> to vector<16x648xbf16>
    %20 = tpu.concatenate %17, %18, %19 in 0 : vector<16x648xbf16>, vector<16x648xbf16>, vector<16x648xbf16> -> vector<48x648xbf16>
    %c2 = arith.constant 2 : index
    %c0_9 = arith.constant 0 : index
    %c0_10 = arith.constant 0 : index
    %21 = vector.load %arg2[%c2, %c0_9, %c0_10] : memref<3x16x48xbf16, #tpu.memory_space<vmem>>, vector<1x16x48xbf16>
    %22 = vector.shape_cast %21 : vector<1x16x48xbf16> to vector<16x48xbf16>
    %cst_11 = arith.constant dense<0.000000e+00> : vector<16x648xf32>
    %23 = tpu.matmul %22, %20, %cst_11 {dimension_numbers = #tpu.dot_dimension_numbers<[1], [0], [0], [1], [0, 0, 1, 1], [], []>} : vector<16x48xbf16>, vector<48x648xbf16>, vector<16x648xf32> -> vector<16x648xf32>
    %24 = arith.addf %16, %23 : vector<16x648xf32>
    %25 = vector.broadcast %0 : vector<1x648xf32> to vector<16x648xf32>
    %26 = arith.mulf %24, %25 : vector<16x648xf32>
    %cst_12 = arith.constant dense<0.000000e+00> : vector<16xf32>
    %27 = vector.multi_reduction <add>, %26, %cst_12 [1] : vector<16x648xf32> to vector<16xf32>
    %28 = vector.shape_cast %27 : vector<16xf32> to vector<16x1xf32>
    %cst_13 = arith.constant 0.001953125 : f32
    %29 = vector.broadcast %cst_13 : f32 to vector<16x1xf32>
    %30 = arith.mulf %28, %29 : vector<16x1xf32>
    %31 = arith.mulf %26, %24 : vector<16x648xf32>
    %cst_14 = arith.constant dense<0.000000e+00> : vector<16xf32>
    %32 = vector.multi_reduction <add>, %31, %cst_14 [1] : vector<16x648xf32> to vector<16xf32>
    %33 = vector.shape_cast %32 : vector<16xf32> to vector<16x1xf32>
    %cst_15 = arith.constant 0.001953125 : f32
    %34 = vector.broadcast %cst_15 : f32 to vector<16x1xf32>
    %35 = arith.mulf %33, %34 : vector<16x1xf32>
    %36 = arith.mulf %30, %30 : vector<16x1xf32>
    %37 = arith.subf %35, %36 : vector<16x1xf32>
    %cst_16 = arith.constant 0.000000e+00 : f32
    %38 = vector.broadcast %cst_16 : f32 to vector<16x1xf32>
    %39 = arith.maximumf %37, %38 : vector<16x1xf32>
    %40 = vector.broadcast %30 : vector<16x1xf32> to vector<16x648xf32>
    %41 = arith.subf %24, %40 : vector<16x648xf32>
    %cst_17 = arith.constant 9.99999974E-6 : f32
    %42 = vector.broadcast %cst_17 : f32 to vector<16x1xf32>
    %43 = arith.addf %39, %42 : vector<16x1xf32>
    %44 = math.rsqrt %43 : vector<16x1xf32>
    %45 = vector.broadcast %44 : vector<16x1xf32> to vector<16x648xf32>
    %46 = arith.mulf %41, %45 : vector<16x648xf32>
    %c0_18 = arith.constant 0 : index
    %c0_19 = arith.constant 0 : index
    %47 = vector.load %arg3[%c0_18, %c0_19] : memref<16x1xf32, #tpu.memory_space<vmem>>, vector<16x1xf32>
    %48 = vector.broadcast %47 : vector<16x1xf32> to vector<16x648xf32>
    %49 = arith.mulf %46, %48 : vector<16x648xf32>
    %c0_20 = arith.constant 0 : index
    %c0_21 = arith.constant 0 : index
    %50 = vector.load %arg4[%c0_20, %c0_21] : memref<16x1xf32, #tpu.memory_space<vmem>>, vector<16x1xf32>
    %51 = vector.broadcast %50 : vector<16x1xf32> to vector<16x648xf32>
    %52 = arith.addf %49, %51 : vector<16x648xf32>
    %cst_22 = arith.constant 0.000000e+00 : f32
    %53 = vector.broadcast %cst_22 : f32 to vector<16x648xf32>
    %54 = arith.maximumf %52, %53 : vector<16x648xf32>
    %55 = vector.broadcast %0 : vector<1x648xf32> to vector<16x648xf32>
    %56 = arith.mulf %54, %55 : vector<16x648xf32>
    %cst_23 = arith.constant 0.000000e+00 : bf16
    %57 = vector.broadcast %cst_23 : bf16 to vector<16x19xbf16>
    %58 = arith.truncf %56 : vector<16x648xf32> to vector<16x648xbf16>
    %59 = tpu.concatenate %57, %58, %57 in 1 : vector<16x19xbf16>, vector<16x648xbf16>, vector<16x19xbf16> -> vector<16x686xbf16>
    %60 = vector.extract_strided_slice %59 {offsets = [0, 0], sizes = [16, 648], strides = [1, 1]} : vector<16x686xbf16> to vector<16x648xbf16>
    %61 = vector.extract_strided_slice %59 {offsets = [0, 1], sizes = [16, 648], strides = [1, 1]} : vector<16x686xbf16> to vector<16x648xbf16>
    %62 = vector.extract_strided_slice %59 {offsets = [0, 2], sizes = [16, 648], strides = [1, 1]} : vector<16x686xbf16> to vector<16x648xbf16>
    %63 = tpu.concatenate %60, %61, %62 in 0 : vector<16x648xbf16>, vector<16x648xbf16>, vector<16x648xbf16> -> vector<48x648xbf16>
    %c0_24 = arith.constant 0 : index
    %c0_25 = arith.constant 0 : index
    %c0_26 = arith.constant 0 : index
    %64 = vector.load %arg5[%c0_24, %c0_25, %c0_26] : memref<3x16x48xbf16, #tpu.memory_space<vmem>>, vector<1x16x48xbf16>
    %65 = vector.shape_cast %64 : vector<1x16x48xbf16> to vector<16x48xbf16>
    %cst_27 = arith.constant dense<0.000000e+00> : vector<16x648xf32>
    %66 = tpu.matmul %65, %63, %cst_27 {dimension_numbers = #tpu.dot_dimension_numbers<[1], [0], [0], [1], [0, 0, 1, 1], [], []>} : vector<16x48xbf16>, vector<48x648xbf16>, vector<16x648xf32> -> vector<16x648xf32>
    %67 = vector.extract_strided_slice %59 {offsets = [0, 18], sizes = [16, 648], strides = [1, 1]} : vector<16x686xbf16> to vector<16x648xbf16>
    %68 = vector.extract_strided_slice %59 {offsets = [0, 19], sizes = [16, 648], strides = [1, 1]} : vector<16x686xbf16> to vector<16x648xbf16>
    %69 = vector.extract_strided_slice %59 {offsets = [0, 20], sizes = [16, 648], strides = [1, 1]} : vector<16x686xbf16> to vector<16x648xbf16>
    %70 = tpu.concatenate %67, %68, %69 in 0 : vector<16x648xbf16>, vector<16x648xbf16>, vector<16x648xbf16> -> vector<48x648xbf16>
    %c1_28 = arith.constant 1 : index
    %c0_29 = arith.constant 0 : index
    %c0_30 = arith.constant 0 : index
    %71 = vector.load %arg5[%c1_28, %c0_29, %c0_30] : memref<3x16x48xbf16, #tpu.memory_space<vmem>>, vector<1x16x48xbf16>
    %72 = vector.shape_cast %71 : vector<1x16x48xbf16> to vector<16x48xbf16>
    %cst_31 = arith.constant dense<0.000000e+00> : vector<16x648xf32>
    %73 = tpu.matmul %72, %70, %cst_31 {dimension_numbers = #tpu.dot_dimension_numbers<[1], [0], [0], [1], [0, 0, 1, 1], [], []>} : vector<16x48xbf16>, vector<48x648xbf16>, vector<16x648xf32> -> vector<16x648xf32>
    %74 = arith.addf %66, %73 : vector<16x648xf32>
    %75 = vector.extract_strided_slice %59 {offsets = [0, 36], sizes = [16, 648], strides = [1, 1]} : vector<16x686xbf16> to vector<16x648xbf16>
    %76 = vector.extract_strided_slice %59 {offsets = [0, 37], sizes = [16, 648], strides = [1, 1]} : vector<16x686xbf16> to vector<16x648xbf16>
    %77 = vector.extract_strided_slice %59 {offsets = [0, 38], sizes = [16, 648], strides = [1, 1]} : vector<16x686xbf16> to vector<16x648xbf16>
    %78 = tpu.concatenate %75, %76, %77 in 0 : vector<16x648xbf16>, vector<16x648xbf16>, vector<16x648xbf16> -> vector<48x648xbf16>
    %c2_32 = arith.constant 2 : index
    %c0_33 = arith.constant 0 : index
    %c0_34 = arith.constant 0 : index
    %79 = vector.load %arg5[%c2_32, %c0_33, %c0_34] : memref<3x16x48xbf16, #tpu.memory_space<vmem>>, vector<1x16x48xbf16>
    %80 = vector.shape_cast %79 : vector<1x16x48xbf16> to vector<16x48xbf16>
    %cst_35 = arith.constant dense<0.000000e+00> : vector<16x648xf32>
    %81 = tpu.matmul %80, %78, %cst_35 {dimension_numbers = #tpu.dot_dimension_numbers<[1], [0], [0], [1], [0, 0, 1, 1], [], []>} : vector<16x48xbf16>, vector<48x648xbf16>, vector<16x648xf32> -> vector<16x648xf32>
    %82 = arith.addf %74, %81 : vector<16x648xf32>
    %83 = vector.broadcast %0 : vector<1x648xf32> to vector<16x648xf32>
    %84 = arith.mulf %82, %83 : vector<16x648xf32>
    %cst_36 = arith.constant dense<0.000000e+00> : vector<16xf32>
    %85 = vector.multi_reduction <add>, %84, %cst_36 [1] : vector<16x648xf32> to vector<16xf32>
    %86 = vector.shape_cast %85 : vector<16xf32> to vector<16x1xf32>
    %cst_37 = arith.constant 0.001953125 : f32
    %87 = vector.broadcast %cst_37 : f32 to vector<16x1xf32>
    %88 = arith.mulf %86, %87 : vector<16x1xf32>
    %89 = arith.mulf %84, %82 : vector<16x648xf32>
    %cst_38 = arith.constant dense<0.000000e+00> : vector<16xf32>
    %90 = vector.multi_reduction <add>, %89, %cst_38 [1] : vector<16x648xf32> to vector<16xf32>
    %91 = vector.shape_cast %90 : vector<16xf32> to vector<16x1xf32>
    %cst_39 = arith.constant 0.001953125 : f32
    %92 = vector.broadcast %cst_39 : f32 to vector<16x1xf32>
    %93 = arith.mulf %91, %92 : vector<16x1xf32>
    %94 = arith.mulf %88, %88 : vector<16x1xf32>
    %95 = arith.subf %93, %94 : vector<16x1xf32>
    %cst_40 = arith.constant 0.000000e+00 : f32
    %96 = vector.broadcast %cst_40 : f32 to vector<16x1xf32>
    %97 = arith.maximumf %95, %96 : vector<16x1xf32>
    %98 = vector.broadcast %88 : vector<16x1xf32> to vector<16x648xf32>
    %99 = arith.subf %82, %98 : vector<16x648xf32>
    %cst_41 = arith.constant 9.99999974E-6 : f32
    %100 = vector.broadcast %cst_41 : f32 to vector<16x1xf32>
    %101 = arith.addf %97, %100 : vector<16x1xf32>
    %102 = math.rsqrt %101 : vector<16x1xf32>
    %103 = vector.broadcast %102 : vector<16x1xf32> to vector<16x648xf32>
    %104 = arith.mulf %99, %103 : vector<16x648xf32>
    %c0_42 = arith.constant 0 : index
    %c0_43 = arith.constant 0 : index
    %105 = vector.load %arg6[%c0_42, %c0_43] : memref<16x1xf32, #tpu.memory_space<vmem>>, vector<16x1xf32>
    %106 = vector.broadcast %105 : vector<16x1xf32> to vector<16x648xf32>
    %107 = arith.mulf %104, %106 : vector<16x648xf32>
    %c0_44 = arith.constant 0 : index
    %c0_45 = arith.constant 0 : index
    %108 = vector.load %arg7[%c0_44, %c0_45] : memref<16x1xf32, #tpu.memory_space<vmem>>, vector<16x1xf32>
    %109 = vector.broadcast %108 : vector<16x1xf32> to vector<16x648xf32>
    %110 = arith.addf %107, %109 : vector<16x648xf32>
    %cst_46 = arith.constant 0.000000e+00 : f32
    %111 = vector.broadcast %cst_46 : f32 to vector<16x648xf32>
    %112 = arith.maximumf %110, %111 : vector<16x648xf32>
    %c0_47 = arith.constant 0 : index
    %c0_48 = arith.constant 0 : index
    %113 = vector.load %arg8[%c0_47, %c0_48] : memref<16x648xf32, #tpu.memory_space<vmem>>, vector<16x648xf32>
    tpu.vector_store %arg8[%c0_47, %c0_48], %112 {strides = array<i32>} : memref<16x648xf32, #tpu.memory_space<vmem>>, vector<16x648xf32>,
    return
  }
}

</mosaic_0001>

<bundles_post_ra>
// kernel: conv_block.1
= control target key start
LH: loop header
LB: loop body
LE: loop exit
PB: predicated region body
PF: predicated region fallthrough
CT: control target
= control target key end

     0   :  { %s1835_s9 = smov 127   ;;  %s1836_s14 = smov 126   ;;  %vm79_vm0 = vcmask 1039360   ;;  %v1838_v12 = vmov 0   ;;  %vm103_vm1 = vcmask 1031168   ;;  %vm161_vm2 = vcmask 900096   ;;  %s2621_s0 = inlined_call_operand.vmem [shape: bf16[16,686], index: 0, kind: input, shape index: {}]   ;;  %s2622_s2 = inlined_call_operand.vmem [shape: bf16[3,16,48], index: 2, kind: input, shape index: {}]   ;;  %s2623_s3 = inlined_call_operand.vmem [shape: f32[16,1], index: 3, kind: input, shape index: {}]   ;;  %s2624_s1 = inlined_call_operand.vmem [shape: f32[1,648], index: 1, kind: input, shape index: {}]   ;;  %s2625_s4 = inlined_call_operand.vmem [shape: f32[16,1], index: 4, kind: input, shape index: {}]   ;;  %s2626_s5 = inlined_call_operand.vmem [shape: bf16[3,16,48], index: 5, kind: input, shape index: {}]   ;;  %s2627_s6 = inlined_call_operand.vmem [shape: f32[16,1], index: 6, kind: input, shape index: {}]   ;;  %s2628_s7 = inlined_call_operand.vmem [shape: f32[16,1], index: 7, kind: input, shape index: {}]   ;;  %s2629_s8 = inlined_call_operand.vmem [shape: f32[16,648], index: 8, kind: output, shape index: {}]  }
   0x1   :  { %v1889_v0 = vld [vmem:[%s2621_s0 + $0xc] ss:$24 sps:$4 sm:$0xff]   ;;  %v1901_v2 = vld [vmem:[%s2621_s0] ss:$24 sps:$4 sm:$0xff]   ;;  %v1930_v5 = vld [vmem:[%s2621_s0 + $0x10] ss:$24 sps:$4 sm:$0xff]   ;;  %231 = vmatprep.mubr.bf16.mxu0 %v1838_v12  ;;  %1810 = vset.pattern.permute.xlu1 %v1838_v12 }
   0x2   :  { %v1894_v1 = vld [vmem:[%s2621_s0 + $0x4] ss:$24 sps:$4 sm:$0xff]   ;;  %73 = vrot.lane.b32.xlu1 %v1889_v0, %s1835_s9  ;;  %v1908_v3 = vld [vmem:[%s2621_s0 + $0x8] ss:$24 sps:$4 sm:$0xff]   ;;  %v1923_v4 = vld [vmem:[%s2621_s0 + $0x14] ss:$24 sps:$4 sm:$0xff]   ;;  %1811 = vset.pattern.permute.xlu0 %v1838_v12 }
   0x3   :  { %69 = vrot.lane.b32.xlu0 %v1894_v1, %s1835_s9  ;;  %s1837_s19 = smov 110   ;;  %1090 = vmatprep.mubr.bf16.mxu1 %v1838_v12  ;;  %s1839_s0 = smov 92   ;;  %v813_v34 = vld [vmem:[%s2623_s3] sm:$0xff]  ;;  %v1821_v45 = vld [vmem:[%s2622_s2 + $0x8] sm:$0xff]   ;;  %vm195_vm3 = vcmask 392192   ;;  %vm509_vm4 = vcmask 752640  }
   0x4   :  { %vm734_vm5 = vcmask 64512   ;;  %vm909_vm6 = vcmask 154624   ;;  %vm924_vm7 = vcmask 220160  }
   0x5   :  { %vm1744_vm8 = vmneg %vm909_vm6 }
   0x6   :  { %67 = vrot.lane.b32.xlu1 %v1901_v2, %s1835_s9 }
   0x7   :  { %71 = vrot.lane.b32.xlu0 %v1908_v3, %s1835_s9 }
   0xa   :  { %95 = vrot.lane.b32.xlu1 %v1908_v3, %s1836_s14 }
   0xb   :  { %93 = vrot.lane.b32.xlu0 %v1894_v1, %s1836_s14 }
   0xe   :  { %91 = vrot.lane.b32.xlu1 %v1901_v2, %s1836_s14 }
   0xf   :  { %97 = vrot.lane.b32.xlu0 %v1889_v0, %s1836_s14 }
  0x12   :  { %77 = vrot.lane.b32.xlu1 %v1923_v4, %s1835_s9 }
  0x13   :  { %75 = vrot.lane.b32.xlu0 %v1930_v5, %s1835_s9 }
  0x16   :  { %101 = vrot.lane.b32.xlu1 %v1923_v4, %s1836_s14 }
  0x17   :  { %99 = vrot.lane.b32.xlu0 %v1930_v5, %s1836_s14 }
  0x1a   :  { %129 = vrot.lane.b32.xlu1 %v1908_v3, %s1837_s19 }
  0x1b   :  { %127 = vrot.lane.b32.xlu0 %v1894_v1, %s1837_s19 }
  0x1f   :  { %125 = vrot.lane.b32.xlu0 %v1901_v2, %s1837_s19 }
  0x74   :  { %v74_v6 = vpop.permute.xlu1 %73 }
  0x75   :  { %v70_v7 = vpop.permute.xlu0 %69 }
  0x78   :  { %v68_v8 = vpop.permute.xlu1 %67 }
  0x79   :  { %v72_v9 = vpop.permute.xlu0 %71  ;;  %v1961_v15 = vsel %vm79_vm0, %v68_v8, %v70_v7 }
  0x7a   :  { %v1947_v10 = vsel %vm79_vm0, %v72_v9, %v74_v6  ;;  %v1950_v11 = vsel %vm79_vm0, %v70_v7, %v72_v9  ;;  %v1822_v7 = vld [vmem:[%s2622_s2] sm:$0xff]  }
  0x7b   :  { %141 = vrot.lane.b32.xlu0 %v1947_v10, %s1837_s19  ;;  %139 = vrot.lane.b32.xlu1 %v1950_v11, %s1837_s19 }
  0x7c   :  { %v96_v13 = vpop.permute.xlu1 %95 }
  0x7d   :  { %v94_v14 = vpop.permute.xlu0 %93 }
  0x7e   :  { %v1964_v16 = vsel %vm103_vm1, %v94_v14, %v96_v13 }
  0x7f   :  { %137 = vrot.lane.b32.xlu1 %v1961_v15, %s1837_s19  ;;  %151 = vrot.lane.b32.xlu0 %v1964_v16, %s1837_s19 }
  0x80   :  { %v92_v17 = vpop.permute.xlu1 %91 }
  0x81   :  { %v98_v18 = vpop.permute.xlu0 %97  ;;  %v1971_v19 = vsel %vm103_vm1, %v92_v17, %v94_v14 }
  0x82   :  { %v1974_v20 = vsel %vm103_vm1, %v96_v13, %v98_v18 }
  0x83   :  { %153 = vrot.lane.b32.xlu1 %v1974_v20, %s1837_s19  ;;  %149 = vrot.lane.b32.xlu0 %v1971_v19, %s1837_s19 }
  0x84   :  { %v1980_v21 = vpop.permute.xlu1 %77 }
  0x85   :  { %v76_v22 = vpop.permute.xlu0 %75 }
  0x86   :  { %v1988_v23 = vsel %vm79_vm0, %v76_v22, %v1980_v21  ;;  %v1993_v26 = vsel %vm79_vm0, %v74_v6, %v76_v22  ;;  %v1823_v22 = vld [vmem:[%s2622_s2 + $0x10] sm:$0xff]  }
  0x87   :  { %131 = vrot.lane.b32.xlu1 %v1889_v0, %s1837_s19  ;;  %133 = vrot.lane.b32.xlu0 %v1930_v5, %s1837_s19 }
  0x88   :  { %v1990_v24 = vpop.permute.xlu1 %101 }
  0x89   :  { %v100_v25 = vpop.permute.xlu0 %99 }
  0x8a   :  { %v2001_v27 = vsel %vm103_vm1, %v100_v25, %v1990_v24  ;;  %v2004_v30 = vsel %vm103_vm1, %v98_v18, %v100_v25 }
  0x8b   :  { %143 = vrot.lane.b32.xlu1 %v1993_v26, %s1837_s19  ;;  %145 = vrot.lane.b32.xlu0 %v1988_v23, %s1837_s19 }
  0x8c   :  { %v130_v28 = vpop.permute.xlu1 %129 }
  0x8d   :  { %v128_v29 = vpop.permute.xlu0 %127 }
  0x8e   :  { %v163_v31 = vsel %vm161_vm2, %v128_v29, %v130_v28 }
  0x8f   :  { %155 = vrot.lane.b32.xlu1 %v2004_v30, %s1837_s19  ;;  %157 = vrot.lane.b32.xlu0 %v2001_v27, %s1837_s19 }
  0x90   :  { %199 = vmatprep.subr.bf16.mxu0 %v163_v31 }
  0x91   :  { %v126_v32 = vpop.permute.xlu0 %125 }
  0x92   :  { %v162_v33 = vsel %vm161_vm2, %v126_v32, %v128_v29 }
  0x93   :  { %135 = vrot.lane.b32.xlu1 %v1923_v4, %s1837_s19  ;;  %147 = vrot.lane.b32.xlu0 %v1980_v21, %s1837_s19 }
  0x94   :  { %200 = vmatpush1.bf16.msra.mxu0 %v162_v33 }
  0x97   :  { %475 = vrot.lane.b32.xlu0 %v1894_v1, %s1839_s0  ;;  %159 = vrot.lane.b32.xlu1 %v1990_v24, %s1837_s19 }
  0x9b   :  { %473 = vrot.lane.b32.xlu0 %v1901_v2, %s1839_s0  ;;  %477 = vrot.lane.b32.xlu1 %v1908_v3, %s1839_s0 }
  0x9f   :  { %489 = vrot.lane.b32.xlu0 %v1947_v10, %s1839_s0  ;;  %487 = vrot.lane.b32.xlu1 %v1950_v11, %s1839_s0 }
  0xa3   :  { %499 = vrot.lane.b32.xlu0 %v1964_v16, %s1839_s0  ;;  %485 = vrot.lane.b32.xlu1 %v1961_v15, %s1839_s0 }
  0xa7   :  { %497 = vrot.lane.b32.xlu0 %v1971_v19, %s1839_s0  ;;  %501 = vrot.lane.b32.xlu1 %v1974_v20, %s1839_s0 }
  0xab   :  { %481 = vrot.lane.b32.xlu0 %v1930_v5, %s1839_s0  ;;  %479 = vrot.lane.b32.xlu1 %v1889_v0, %s1839_s0 }
  0xaf   :  { %493 = vrot.lane.b32.xlu0 %v1988_v23, %s1839_s0  ;;  %491 = vrot.lane.b32.xlu1 %v1993_v26, %s1839_s0 }
  0xb3   :  { %505 = vrot.lane.b32.xlu0 %v2001_v27, %s1839_s0  ;;  %503 = vrot.lane.b32.xlu1 %v2004_v30, %s1839_s0 }
  0xb7   :  { %495 = vrot.lane.b32.xlu0 %v1980_v21, %s1839_s0  ;;  %483 = vrot.lane.b32.xlu1 %v1923_v4, %s1839_s0 }
  0xbb   :  { %507 = vrot.lane.b32.xlu1 %v1990_v24, %s1839_s0 }
  0xbf   :  { %817 = vperm.xlu1 %1810, %v813_v34  }
  0xed   :  { %v142_v35 = vpop.permute.xlu0 %141  ;;  %v140_v36 = vpop.permute.xlu1 %139 }
  0xee   :  { %v168_v37 = vsel %vm161_vm2, %v140_v36, %v142_v35 }
  0xef   :  { %201 = vmatprep.subr.bf16.mxu0 %v168_v37 }
  0xf1   :  { %v152_v38 = vpop.permute.xlu0 %151  ;;  %v138_v39 = vpop.permute.xlu1 %137 }
  0xf2   :  { %v167_v40 = vsel %vm161_vm2, %v138_v39, %v140_v36  ;;  %v688_v36 = vlaneseq  ;;  %v30_v39 = vld [vmem:[%s2624_s1] sm:$0x3f] }
  0xf3   :  { %202 = vmatpush1.bf16.msra.mxu0 %v167_v40 }
  0xf4   :  { %v689_v37 = vshrl.u32 %v688_v36, 7 }
  0xf5   :  { %v150_v41 = vpop.permute.xlu0 %149  ;;  %v154_v42 = vpop.permute.xlu1 %153 }
  0xf6   :  { %v173_v43 = vsel %vm161_vm2, %v152_v38, %v154_v42  ;;  %v172_v44 = vsel %vm161_vm2, %v150_v41, %v152_v38  ;;  %v690_v38 = vsub.s32 0, %v689_v37  ;;  %v694_v40 = vsub.s32 1, %v689_v37 }
  0xf7   :  { %203 = vmatprep.subr.bf16.mxu0 %v173_v43 }
  0xf8   :  { %204 = vmatpush1.bf16.msra.mxu0 %v172_v44  ;;  %v2132_v41 = vrot.slane %v30_v39, %v690_v38 }
  0xf9   :  { %v134_v46 = vpop.permute.xlu0 %133  ;;  %v132_v47 = vpop.permute.xlu1 %131 }
  0xfa   :  { %v165_v48 = vsel %vm161_vm2, %v132_v47, %v134_v46  ;;  %v164_v49 = vsel %vm161_vm2, %v130_v28, %v132_v47 }
  0xfb   :  { %242 = vmatprep.subr.bf16.mxu0 %v165_v48  ;;  %1724 = vmatmul.mubr.msk.bf16.vlgmr.msra.gmra.mrb[0].mxu0 %vm195_vm3, %v1821_v45 }
  0xfc   :  { %243 = vmatpush1.bf16.msra.mxu0 %v164_v49  ;;  %274 = vmatprep.mubr.bf16.mxu0 %v1838_v12 }
  0xfd   :  { %v146_v50 = vpop.permute.xlu0 %145  ;;  %v144_v51 = vpop.permute.xlu1 %143 }
  0xfe   :  { %v170_v52 = vsel %vm161_vm2, %v144_v51, %v146_v50  ;;  %v169_v53 = vsel %vm161_vm2, %v142_v35, %v144_v51 }
  0xff   :  { %244 = vmatprep.subr.bf16.mxu0 %v170_v52 }
 0x100   :  { %245 = vmatpush1.bf16.msra.mxu0 %v169_v53 }
 0x101   :  { %v158_v54 = vpop.permute.xlu0 %157  ;;  %v156_v55 = vpop.permute.xlu1 %155 }
 0x102   :  { %v175_v56 = vsel %vm161_vm2, %v156_v55, %v158_v54  ;;  %v174_v57 = vsel %vm161_vm2, %v154_v42, %v156_v55  ;;  %v2134_v42 = vrot.slane %v30_v39, %v694_v40  ;;  %v698_v55 = vsub.s32 2, %v689_v37 }
 0x103   :  { %246 = vmatprep.subr.bf16.mxu0 %v175_v56 }
 0x104   :  { %247 = vmatpush1.bf16.msra.mxu0 %v174_v57 }
 0x105   :  { %v136_v58 = vpop.permute.xlu1 %135  ;;  %v148_v60 = vpop.permute.xlu0 %147 }
 0x106   :  { %v166_v59 = vsel %vm161_vm2, %v134_v46, %v136_v58  ;;  %285 = vmatprep.subr.bf16.mxu0 %v136_v58  ;;  %v171_v61 = vsel %vm161_vm2, %v146_v50, %v148_v60 }
 0x107   :  { %1725 = vmatmul.mubr.msk.bf16.vlgmr.msra.gmra.mrb[4].mxu0 %vm195_vm3, %v1821_v45 }
 0x108   :  { %286 = vmatpush1.bf16.msra.mxu0 %v166_v59  ;;  %317 = vmatprep.mubr.bf16.mxu0 %v1838_v12  ;;  %v702_v59 = vsub.s32 3, %v689_v37 }
 0x109   :  { %287 = vmatprep.subr.bf16.mxu0 %v148_v60  ;;  %v160_v62 = vpop.permute.xlu1 %159  ;;  %v476_v6 = vpop.permute.xlu0 %475 }
 0x10a   :  { %v176_v63 = vsel %vm161_vm2, %v158_v54, %v160_v62 }
 0x10c   :  { %288 = vmatpush1.bf16.msra.mxu0 %v171_v61  ;;  %v2156_v61 = vrot.slane %v30_v39, %v698_v55  ;;  %v838_v55 = vld [vmem:[%s2625_s4 + $0x8] sm:$0xff] }
 0x10d   :  { %289 = vmatprep.subr.bf16.mxu0 %v160_v62  ;;  %v2158_v62 = vrot.slane %v30_v39, %v702_v59 }
 0x110   :  { %290 = vmatpush1.bf16.msra.mxu0 %v176_v63 }
 0x111   :  { %336 = vmatprep.subr.bf16.mxu0 %v1894_v1  ;;  %v474_v1 = vpop.permute.xlu0 %473 }
 0x113   :  { %1726 = vmatmul.mubr.msk.bf16.vlgmr.msra.gmra.mrb[8].mxu0 %vm195_vm3, %v1821_v45 }
 0x114   :  { %337 = vmatpush1.bf16.msra.mxu0 %v1901_v2  ;;  %368 = vmatprep.mubr.bf16.mxu0 %v1838_v12  ;;  %v478_v2 = vpop.permute.xlu1 %477 }
 0x115   :  { %338 = vmatprep.subr.bf16.mxu0 %v1950_v11  ;;  %v490_v8 = vpop.permute.xlu0 %489 }
 0x118   :  { %339 = vmatpush1.bf16.msra.mxu0 %v1961_v15  ;;  %v488_v9 = vpop.permute.xlu1 %487 }
 0x119   :  { %340 = vmatprep.subr.bf16.mxu0 %v1964_v16  ;;  %v516_v13 = vsel %vm509_vm4, %v488_v9, %v490_v8 }
 0x11c   :  { %341 = vmatpush1.bf16.msra.mxu0 %v1971_v19 }
 0x11d   :  { %379 = vmatprep.subr.bf16.mxu0 %v1889_v0  ;;  %v500_v0 = vpop.permute.xlu0 %499 }
 0x11f   :  { %1728 = vmatmul.mubr.msk.bf16.vlgmr.msra.gmra.mrb[0].mxu0 %vm195_vm3, %v1822_v7 }
 0x120   :  { %380 = vmatpush1.bf16.msra.mxu0 %v1908_v3  ;;  %411 = vmatprep.mubr.bf16.mxu0 %v1838_v12  ;;  %v486_v3 = vpop.permute.xlu1 %485 }
 0x121   :  { %381 = vmatprep.subr.bf16.mxu0 %v1993_v26  ;;  %v515_v16 = vsel %vm509_vm4, %v486_v3, %v488_v9 }
 0x124   :  { %382 = vmatpush1.bf16.msra.mxu0 %v1947_v10  ;;  %v498_v10 = vpop.permute.xlu0 %497  ;;  %v502_v11 = vpop.permute.xlu1 %501 }
 0x125   :  { %383 = vmatprep.subr.bf16.mxu0 %v2004_v30  ;;  %v521_v17 = vsel %vm509_vm4, %v500_v0, %v502_v11  ;;  %v520_v19 = vsel %vm509_vm4, %v498_v10, %v500_v0 }
 0x128   :  { %384 = vmatpush1.bf16.msra.mxu0 %v1974_v20  ;;  %v482_v14 = vpop.permute.xlu0 %481  ;;  %v480_v15 = vpop.permute.xlu1 %479 }
 0x129   :  { %422 = vmatprep.subr.bf16.mxu0 %v1923_v4  ;;  %v511_v4 = vsel %vm509_vm4, %v476_v6, %v478_v2  ;;  %v513_v18 = vsel %vm509_vm4, %v480_v15, %v482_v14 }
 0x12b   :  { %1729 = vmatmul.mubr.msk.bf16.vlgmr.msra.gmra.mrb[4].mxu0 %vm195_vm3, %v1822_v7 }
 0x12c   :  { %423 = vmatpush1.bf16.msra.mxu0 %v1930_v5  ;;  %454 = vmatprep.mubr.bf16.mxu0 %v1838_v12  ;;  %v510_v5 = vsel %vm509_vm4, %v474_v1, %v476_v6  ;;  %v494_v20 = vpop.permute.xlu0 %493 }
 0x12d   :  { %424 = vmatprep.subr.bf16.mxu0 %v1980_v21  ;;  %v492_v21 = vpop.permute.xlu1 %491 }
 0x130   :  { %425 = vmatpush1.bf16.msra.mxu0 %v1988_v23  ;;  %v512_v23 = vsel %vm509_vm4, %v478_v2, %v480_v15  ;;  %v506_v25 = vpop.permute.xlu0 %505 }
 0x131   :  { %426 = vmatprep.subr.bf16.mxu0 %v1990_v24  ;;  %v518_v24 = vsel %vm509_vm4, %v492_v21, %v494_v20  ;;  %v504_v26 = vpop.permute.xlu1 %503 }
 0x132   :  { %v523_v28 = vsel %vm509_vm4, %v504_v26, %v506_v25  ;;  %v522_v29 = vsel %vm509_vm4, %v502_v11, %v504_v26 }
 0x134   :  { %427 = vmatpush1.bf16.msra.mxu0 %v2001_v27  ;;  %v517_v27 = vsel %vm509_vm4, %v490_v8, %v492_v21  ;;  %v496_v32 = vpop.permute.xlu0 %495 }
 0x135   :  { %546 = vmatprep.subr.bf16.mxu0 %v511_v4  ;;  %v484_v30 = vpop.permute.xlu1 %483  ;;  %v519_v33 = vsel %vm509_vm4, %v494_v20, %v496_v32  ;;  %v706_v4 = vsub.s32 4, %v689_v37 }
 0x136   :  { %v514_v31 = vsel %vm509_vm4, %v482_v14, %v484_v30 }
 0x137   :  { %1730 = vmatmul.mubr.msk.bf16.vlgmr.msra.gmra.mrb[8].mxu0 %vm195_vm3, %v1822_v7  ;;  %v2180_v21 = vrot.slane %v30_v39, %v706_v4 }
 0x138   :  { %547 = vmatpush1.bf16.msra.mxu0 %v510_v5  ;;  %578 = vmatprep.mubr.bf16.mxu0 %v1838_v12 }
 0x139   :  { %548 = vmatprep.subr.bf16.mxu0 %v516_v13  ;;  %v508_v34 = vpop.permute.xlu1 %507 }
 0x13a   :  { %v524_v35 = vsel %vm509_vm4, %v506_v25, %v508_v34 }
 0x13c   :  { %549 = vmatpush1.bf16.msra.mxu0 %v515_v16 }
 0x13d   :  { %550 = vmatprep.subr.bf16.mxu0 %v521_v17  ;;  %v710_v17 = vsub.s32 5, %v689_v37 }
 0x140   :  { %551 = vmatpush1.bf16.msra.mxu0 %v520_v19 }
 0x141   :  { %589 = vmatprep.subr.bf16.mxu0 %v513_v18 }
 0x143   :  { %1734 = vmatmul.mubr.msk.bf16.vlgmr.msra.gmra.mrb[0].mxu0 %vm195_vm3, %v1823_v22 }
 0x144   :  { %590 = vmatpush1.bf16.msra.mxu0 %v512_v23  ;;  %621 = vmatprep.mubr.bf16.mxu0 %v1838_v12  ;;  %v2182_v23 = vrot.slane %v30_v39, %v710_v17 }
 0x145   :  { %591 = vmatprep.subr.bf16.mxu0 %v518_v24 }
 0x148   :  { %592 = vmatpush1.bf16.msra.mxu0 %v517_v27 }
 0x149   :  { %593 = vmatprep.subr.bf16.mxu0 %v523_v28 }
 0x14c   :  { %594 = vmatpush1.bf16.msra.mxu0 %v522_v29 }
 0x14d   :  { %632 = vmatprep.subr.bf16.mxu0 %v484_v30 }
 0x14f   :  { %1735 = vmatmul.mubr.msk.bf16.vlgmr.msra.gmra.mrb[4].mxu0 %vm195_vm3, %v1823_v22 }
 0x150   :  { %633 = vmatpush1.bf16.msra.mxu0 %v514_v31  ;;  %664 = vmatprep.mubr.bf16.mxu0 %v1838_v12 }
 0x151   :  { %634 = vmatprep.subr.bf16.mxu0 %v496_v32 }
 0x154   :  { %635 = vmatpush1.bf16.msra.mxu0 %v519_v33 }
 0x155   :  { %636 = vmatprep.subr.bf16.mxu0 %v508_v34 }
 0x158   :  { %637 = vmatpush1.bf16.msra.mxu0 %v524_v35 }
 0x15b   :  { %1736 = vmatmul.mubr.msk.bf16.vlgmr.msra.gmra.mrb[8].mxu0 %vm195_vm3, %v1823_v22 }
 0x216   :  { %v2136_v43 = vpop.f32.mrb[0].mxu0 }
 0x217   :  { %v718_v44 = vmul.f32 %v2132_v41, %v2136_v43  ;;  %v2140_v45 = vpop.f32.mrb[1].mxu0 }
 0x218   :  { %v719_v46 = vmul.f32 %v2134_v42, %v2140_v45  ;;  %v2144_v47 = vpop.f32.mrb[2].mxu0 }
 0x219   :  { %v749_v48 = vmul.f32 %v718_v44, %v2136_v43  ;;  %v724_v49 = vmul.f32 %v2132_v41, %v2144_v47  ;;  %v2149_v50 = vpop.f32.mrb[3].mxu0 }
 0x21a   :  { %v730_v51 = vadd.f32 %v719_v46, %v718_v44  ;;  %v750_v52 = vmul.f32 %v719_v46, %v2140_v45  ;;  %v725_v53 = vmul.f32 %v2134_v42, %v2149_v50 }
 0x21b   :  { %v755_v54 = vmul.f32 %v724_v49, %v2144_v47 }
 0x21c   :  { %v761_v56 = vadd.f32 %v750_v52, %v749_v48  ;;  %v739_v57 = vadd.f32 %v725_v53, %v724_v49  ;;  %v756_v58 = vmul.f32 %v725_v53, %v2149_v50 }
 0x21e   :  { %v769_v60 = vadd.f32 %v756_v58, %v755_v54  ;;  %v837_v54 = vld [vmem:[%s2625_s4] sm:$0xff] }
 0x222   :  { %v2160_v63 = vpop.f32.mrb[4].mxu0 }
 0x223   :  { %v720_v6 = vmul.f32 %v2156_v61, %v2160_v63  ;;  %v2164_v7 = vpop.f32.mrb[5].mxu0 }
 0x224   :  { %v721_v1 = vmul.f32 %v2158_v62, %v2164_v7  ;;  %v2168_v2 = vpop.f32.mrb[6].mxu0 }
 0x225   :  { %v731_v8 = vadd.f32 %v730_v51, %v720_v6  ;;  %v751_v9 = vmul.f32 %v720_v6, %v2160_v63  ;;  %v726_v0 = vmul.f32 %v2156_v61, %v2168_v2  ;;  %v2173_v3 = vpop.f32.mrb[7].mxu0 }
 0x226   :  { %v752_v10 = vmul.f32 %v721_v1, %v2164_v7  ;;  %v727_v11 = vmul.f32 %v2158_v62, %v2173_v3 }
 0x227   :  { %v762_v5 = vadd.f32 %v761_v56, %v751_v9  ;;  %v740_v13 = vadd.f32 %v739_v57, %v726_v0  ;;  %v757_v14 = vmul.f32 %v726_v0, %v2168_v2  ;;  %v732_v15 = vadd.f32 %v731_v8, %v721_v1  ;;  %v814_v56 = vld [vmem:[%s2623_s3 + $0x8] sm:$0xff]  ;;  %v818_v57 = vpop.permute.xlu1 %817  ;;  %s1840_s3 = smov 19  }
 0x228   :  { %v758_v16 = vmul.f32 %v727_v11, %v2173_v3 }
 0x229   :  { %v770_v18 = vadd.f32 %v769_v60, %v757_v14  ;;  %v741_v19 = vadd.f32 %v740_v13, %v727_v11  ;;  %v763_v20 = vadd.f32 %v762_v5, %v752_v10 }
 0x22b   :  { %v771_v22 = vadd.f32 %v770_v18, %v758_v16 }
 0x22e   :  { %v2184_v24 = vpop.f32.mrb[8].mxu0 }
 0x22f   :  { %v722_v25 = vmul.f32 %v2180_v21, %v2184_v24  ;;  %v2188_v26 = vpop.f32.mrb[9].mxu0 }
 0x230   :  { %v723_v27 = vmul.f32 %v2182_v23, %v2188_v26  ;;  %v2192_v28 = vpop.f32.mrb[10].mxu0 }
 0x231   :  { %v753_v29 = vmul.f32 %v722_v25, %v2184_v24  ;;  %v728_v30 = vmul.f32 %v2180_v21, %v2192_v28  ;;  %v2197_v31 = vpop.f32.mrb[11].mxu0  ;;  %v733_v32 = vadd.f32 %v732_v15, %v722_v25 }
 0x232   :  { %v754_v33 = vmul.f32 %v723_v27, %v2188_v26  ;;  %v729_v34 = vmul.f32 %v2182_v23, %v2197_v31  ;;  %v735_v35 = vsel %vm734_vm5, %v723_v27, 0.0 }
 0x233   :  { %v759_v36 = vmul.f32 %v728_v30, %v2192_v28  ;;  %v736_v37 = vadd.f32 %v735_v35, %v733_v32  ;;  %v742_v38 = vadd.f32 %v741_v19, %v728_v30  ;;  %v764_v39 = vadd.f32 %v763_v20, %v753_v29 }
 0x234   :  { %v760_v40 = vmul.f32 %v729_v34, %v2197_v31  ;;  %v743_v44 = vsel %vm734_vm5, %v729_v34, 0.0  ;;  %v765_v46 = vsel %vm734_vm5, %v754_v33, 0.0 }
 0x235   :  { %737 = vadd.xlane.f32.xlu0 %v736_v37  ;;  %v744_v48 = vadd.f32 %v743_v44, %v742_v38  ;;  %v766_v49 = vadd.f32 %v765_v46, %v764_v39  ;;  %v772_v51 = vadd.f32 %v771_v22, %v759_v36 }
 0x236   :  { %v773_v52 = vsel %vm734_vm5, %v760_v40, 0.0 }
 0x237   :  { %745 = vadd.xlane.f32.xlu1 %v744_v48  ;;  %v774_v53 = vadd.f32 %v773_v52, %v772_v51 }
 0x239   :  { %767 = vadd.xlane.f32.xlu0 %v766_v49 }
 0x23d   :  { %775 = vadd.xlane.f32.xlu0 %v774_v53 }
 0x248   :  { %841 = vperm.xlu1 %1810, %v837_v54  }
 0x24c   :  { %846 = vperm.xlu1 %1810, %v838_v55  }
 0x253   :  { %822 = vperm.xlu0 %1811, %v814_v56  }
 0x2c2   :  { %v738_v58 = vpop.xlane.xlu0 %737 }
 0x2c3   :  { %v747_v59 = vmul.f32 0.001953125, %v738_v58 }
 0x2c4   :  { %v746_v60 = vpop.xlane.xlu1 %745 }
 0x2c5   :  { %v2217_v1 = vmul.f32 0.001953125, %v746_v60  ;;  %v779_v8 = vmul.f32 %v747_v59, %v747_v59  ;;  %v785_v17 = vsub.f32 %v2136_v43, %v747_v59  ;;  %v786_v18 = vsub.f32 %v2140_v45, %v747_v59 }
 0x2c6   :  { %v768_v6 = vpop.xlane.xlu0 %767  ;;  %v787_v19 = vsub.f32 %v2160_v63, %v747_v59  ;;  %v788_v20 = vsub.f32 %v2164_v7, %v747_v59  ;;  %v789_v25 = vsub.f32 %v2184_v24, %v747_v59  ;;  %v790_v27 = vsub.f32 %v2188_v26, %v747_v59 }
 0x2c7   :  { %v777_v9 = vmul.f32 0.001953125, %v768_v6  ;;  %v780_v5 = vmul.f32 %v2217_v1, %v2217_v1  ;;  %v791_v35 = vsub.f32 %v2144_v47, %v2217_v1  ;;  %v792_v43 = vsub.f32 %v2149_v50, %v2217_v1 }
 0x2c8   :  { %v842_v34 = vpop.permute.xlu1 %841  ;;  %v793_v45 = vsub.f32 %v2168_v2, %v2217_v1  ;;  %v794_v39 = vsub.f32 %v2173_v3, %v2217_v1  ;;  %v795_v40 = vsub.f32 %v2192_v28, %v2217_v1  ;;  %v796_v28 = vsub.f32 %v2197_v31, %v2217_v1 }
 0x2c9   :  { %v781_v0 = vsub.f32 %v777_v9, %v779_v8 }
 0x2ca   :  { %v776_v10 = vpop.xlane.xlu0 %775 }
 0x2cb   :  { %v783_v11 = vmax.f32 %v781_v0, 0.0  ;;  %v778_v4 = vmul.f32 0.001953125, %v776_v10 }
 0x2cc   :  { %v847_v59 = vpop.permute.xlu1 %846 }
 0x2cd   :  { %v797_v13 = vadd.f32 1e-05, %v783_v11  ;;  %v782_v14 = vsub.f32 %v778_v4, %v780_v5 }
 0x2cf   :  { %1827 = vrsqrt.f32 %v797_v13  ;;  %v784_v15 = vmax.f32 %v782_v14, 0.0 }
 0x2d1   :  { %v798_v16 = vadd.f32 1e-05, %v784_v15 }
 0x2d2   :  { %v823_v38 = vpop.permute.xlu0 %822 }
 0x2d3   :  { %1829 = vrsqrt.f32 %v798_v16 }
 0x2d9   :  { %v1828_v22 = vpop.eup %1827 }
 0x2da   :  { %v801_v29 = vmul.f32 %v1828_v22, %v785_v17  ;;  %v802_v30 = vmul.f32 %v1828_v22, %v786_v18  ;;  %v803_v32 = vmul.f32 %v1828_v22, %v787_v19  ;;  %v804_v33 = vmul.f32 %v1828_v22, %v788_v20 }
 0x2db   :  { %v805_v63 = vmul.f32 %v1828_v22, %v789_v25  ;;  %v806_v44 = vmul.f32 %v1828_v22, %v790_v27 }
 0x2dc   :  { %v825_v7 = vmul.f32 %v818_v57, %v801_v29  ;;  %v826_v36 = vmul.f32 %v818_v57, %v802_v30  ;;  %v827_v24 = vmul.f32 %v818_v57, %v803_v32  ;;  %v828_v37 = vmul.f32 %v818_v57, %v804_v33 }
 0x2dd   :  { %v1830_v26 = vpop.eup %1829  ;;  %v829_v47 = vmul.f32 %v818_v57, %v805_v63  ;;  %v830_v6 = vmul.f32 %v818_v57, %v806_v44 }
 0x2de   :  { %v807_v46 = vmul.f32 %v1830_v26, %v791_v35  ;;  %v849_v50 = vadd.f32 %v842_v34, %v825_v7  ;;  %v808_v48 = vmul.f32 %v1830_v26, %v792_v43  ;;  %v850_v49 = vadd.f32 %v842_v34, %v826_v36 }
 0x2df   :  { %v809_v2 = vmul.f32 %v1830_v26, %v793_v45  ;;  %v851_v51 = vadd.f32 %v842_v34, %v827_v24  ;;  %v810_v52 = vmul.f32 %v1830_v26, %v794_v39  ;;  %v852_v53 = vadd.f32 %v842_v34, %v828_v37 }
 0x2e0   :  { %v831_v54 = vmul.f32 %v823_v38, %v807_v46  ;;  %v861_v55 = vmax.f32 %v849_v50, 0.0  ;;  %v832_v56 = vmul.f32 %v823_v38, %v808_v48  ;;  %v862_v58 = vmax.f32 %v850_v49, 0.0 }
 0x2e1   :  { %v833_v60 = vmul.f32 %v823_v38, %v809_v2  ;;  %v834_v3 = vmul.f32 %v823_v38, %v810_v52  ;;  %v863_v0 = vmax.f32 %v851_v51, 0.0  ;;  %v864_v10 = vmax.f32 %v852_v53, 0.0 }
 0x2e2   :  { %v855_v8 = vadd.f32 %v847_v59, %v831_v54  ;;  %v856_v9 = vadd.f32 %v847_v59, %v832_v56  ;;  %v873_v11 = vmul.f32 %v861_v55, %v2132_v41  ;;  %v874_v4 = vmul.f32 %v862_v58, %v2134_v42 }
 0x2e3   :  { %v857_v5 = vadd.f32 %v847_v59, %v833_v60  ;;  %v858_v13 = vadd.f32 %v847_v59, %v834_v3  ;;  %v811_v16 = vmul.f32 %v1830_v26, %v795_v40  ;;  %v853_v17 = vadd.f32 %v842_v34, %v829_v47 }
 0x2e4   :  { %v867_v14 = vmax.f32 %v855_v8, 0.0  ;;  %v868_v15 = vmax.f32 %v856_v9, 0.0  ;;  %v812_v20 = vmul.f32 %v1830_v26, %v796_v28  ;;  %v854_v22 = vadd.f32 %v842_v34, %v830_v6 }
 0x2e5   :  { %v869_v18 = vmax.f32 %v857_v5, 0.0  ;;  %v870_v19 = vmax.f32 %v858_v13, 0.0  ;;  %v875_v1 = vmul.f32 %v863_v0, %v2156_v61  ;;  %v835_v25 = vmul.f32 %v823_v38, %v811_v16 }
 0x2e6   :  { %v879_v31 = vmul.f32 %v867_v14, %v2132_v41  ;;  %v880_v57 = vmul.f32 %v868_v15, %v2134_v42  ;;  %v876_v29 = vmul.f32 %v864_v10, %v2158_v62  ;;  %v836_v32 = vmul.f32 %v823_v38, %v812_v20 }
 0x2e7   :  { %v881_v27 = vmul.f32 %v869_v18, %v2156_v61  ;;  %v882_v30 = vmul.f32 %v870_v19, %v2158_v62  ;;  %v859_v43 = vadd.f32 %v847_v59, %v835_v25  ;;  %v865_v45 = vmax.f32 %v853_v17, 0.0 }
 0x2e8   :  { %v885_v33 = vpack.c.bf16 %v879_v31, %v873_v11  ;;  %v886_v35 = vpack.c.bf16 %v880_v57, %v874_v4  ;;  %v860_v7 = vadd.f32 %v847_v59, %v836_v32  ;;  %v866_v36 = vmax.f32 %v854_v22, 0.0  ;;  %v1639_v32 = vld [vmem:[%s2627_s6] sm:$0xff] }
 0x2e9   :  { %v887_v63 = vpack.c.bf16 %v881_v27, %v875_v1  ;;  %v888_v34 = vpack.c.bf16 %v882_v30, %v876_v29  ;;  %v871_v24 = vmax.f32 %v859_v43, 0.0  ;;  %v877_v26 = vmul.f32 %v865_v45, %v2180_v21 }
 0x2ea   :  { %897 = vrot.lane.b32.xlu1 %v885_v33, %s1840_s3  ;;  %v872_v37 = vmax.f32 %v860_v7, 0.0  ;;  %v878_v40 = vmul.f32 %v866_v36, %v2182_v23 }
 0x2eb   :  { %v883_v39 = vmul.f32 %v871_v24, %v2180_v21 }
 0x2ec   :  { %v884_v38 = vmul.f32 %v872_v37, %v2182_v23 }
 0x2ed   :  { %v889_v47 = vpack.c.bf16 %v883_v39, %v877_v26  ;;  %v1824_v26 = vld [vmem:[%s2626_s5 + $0x8] sm:$0xff]  }
 0x2ee   :  { %899 = vrot.lane.b32.xlu1 %v886_v35, %s1840_s3  ;;  %v890_v44 = vpack.c.bf16 %v884_v38, %v878_v40 }
 0x2f2   :  { %901 = vrot.lane.b32.xlu1 %v887_v63, %s1840_s3 }
 0x2f6   :  { %903 = vrot.lane.b32.xlu1 %v888_v34, %s1840_s3 }
 0x2fa   :  { %905 = vrot.lane.b32.xlu1 %v889_v47, %s1840_s3 }
 0x2fe   :  { %907 = vrot.lane.b32.xlu1 %v890_v44, %s1840_s3 }
 0x35c   :  { %v2251_v46 = vpop.permute.xlu1 %897 }
 0x35d   :  { %v2269_v53 = vsel %vm909_vm6, 0, %v2251_v46 }
 0x360   :  { %v900_v50 = vpop.permute.xlu1 %899 }
 0x361   :  { %v2255_v48 = vsel %vm909_vm6, %v2251_v46, %v900_v50 }
 0x362   :  { %932 = vrot.lane.b32.xlu0 %v2255_v48, %s1835_s9 }
 0x364   :  { %v902_v49 = vpop.permute.xlu1 %901 }
 0x365   :  { %v2260_v2 = vsel %vm909_vm6, %v900_v50, %v902_v49 }
 0x366   :  { %934 = vrot.lane.b32.xlu1 %v2260_v2, %s1835_s9 }
 0x368   :  { %v904_v51 = vpop.permute.xlu1 %903 }
 0x369   :  { %v2265_v52 = vsel %vm909_vm6, %v902_v49, %v904_v51 }
 0x36a   :  { %930 = vrot.lane.b32.xlu1 %v2269_v53, %s1835_s9  ;;  %936 = vrot.lane.b32.xlu0 %v2265_v52, %s1835_s9 }
 0x36c   :  { %v906_v54 = vpop.permute.xlu1 %905 }
 0x36d   :  { %v2287_v58 = vsel %vm909_vm6, %v904_v51, %v906_v54 }
 0x36e   :  { %957 = vrot.lane.b32.xlu1 %v2260_v2, %s1836_s14  ;;  %955 = vrot.lane.b32.xlu0 %v2255_v48, %s1836_s14 }
 0x370   :  { %v908_v55 = vpop.permute.xlu1 %907 }
 0x371   :  { %v2280_v56 = vsel %vm909_vm6, %v906_v54, %v908_v55 }
 0x372   :  { %953 = vrot.lane.b32.xlu1 %v2269_v53, %s1836_s14  ;;  %959 = vrot.lane.b32.xlu0 %v2265_v52, %s1836_s14  ;;  %v2291_v59 = vsel %vm924_vm7, %v2280_v56, 0 }
 0x376   :  { %938 = vrot.lane.b32.xlu0 %v2287_v58, %s1835_s9  ;;  %940 = vrot.lane.b32.xlu1 %v2291_v59, %s1835_s9 }
 0x37a   :  { %961 = vrot.lane.b32.xlu0 %v2287_v58, %s1836_s14  ;;  %963 = vrot.lane.b32.xlu1 %v2291_v59, %s1836_s14 }
 0x37e   :  { %988 = vrot.lane.b32.xlu0 %v2255_v48, %s1837_s19  ;;  %990 = vrot.lane.b32.xlu1 %v2260_v2, %s1837_s19 }
 0x382   :  { %986 = vrot.lane.b32.xlu0 %v2269_v53, %s1837_s19 }
 0x3d4   :  { %v933_v60 = vpop.permute.xlu0 %932 }
 0x3d8   :  { %v935_v3 = vpop.permute.xlu1 %934 }
 0x3d9   :  { %v2308_v28 = vsel %vm79_vm0, %v933_v60, %v935_v3 }
 0x3da   :  { %1000 = vrot.lane.b32.xlu1 %v2308_v28, %s1837_s19 }
 0x3dc   :  { %v937_v6 = vpop.permute.xlu0 %936  ;;  %v931_v8 = vpop.permute.xlu1 %930 }
 0x3dd   :  { %v2313_v9 = vsel %vm79_vm0, %v935_v3, %v937_v6  ;;  %v2316_v0 = vsel %vm79_vm0, %v931_v8, %v933_v60 }
 0x3de   :  { %1002 = vrot.lane.b32.xlu0 %v2313_v9, %s1837_s19  ;;  %998 = vrot.lane.b32.xlu1 %v2316_v0, %s1837_s19 }
 0x3e0   :  { %v956_v10 = vpop.permute.xlu0 %955  ;;  %v958_v11 = vpop.permute.xlu1 %957 }
 0x3e1   :  { %v2323_v4 = vsel %vm103_vm1, %v956_v10, %v958_v11 }
 0x3e2   :  { %1012 = vrot.lane.b32.xlu0 %v2323_v4, %s1837_s19 }
 0x3e4   :  { %v960_v5 = vpop.permute.xlu0 %959  ;;  %v954_v13 = vpop.permute.xlu1 %953 }
 0x3e5   :  { %v2328_v14 = vsel %vm103_vm1, %v958_v11, %v960_v5  ;;  %v2331_v15 = vsel %vm103_vm1, %v954_v13, %v956_v10  ;;  %v1825_v13 = vld [vmem:[%s2626_s5] sm:$0xff]  }
 0x3e6   :  { %1014 = vrot.lane.b32.xlu1 %v2328_v14, %s1837_s19  ;;  %1010 = vrot.lane.b32.xlu0 %v2331_v15, %s1837_s19 }
 0x3e8   :  { %v939_v16 = vpop.permute.xlu0 %938  ;;  %v2337_v17 = vpop.permute.xlu1 %940 }
 0x3e9   :  { %v2346_v20 = vsel %vm79_vm0, %v937_v6, %v939_v16  ;;  %v2350_v22 = vsel %vm79_vm0, %v939_v16, %v2337_v17 }
 0x3ea   :  { %992 = vrot.lane.b32.xlu1 %v2265_v52, %s1837_s19  ;;  %994 = vrot.lane.b32.xlu0 %v2287_v58, %s1837_s19 }
 0x3ec   :  { %v962_v18 = vpop.permute.xlu0 %961  ;;  %v2343_v19 = vpop.permute.xlu1 %963 }
 0x3ed   :  { %v2357_v1 = vsel %vm103_vm1, %v960_v5, %v962_v18  ;;  %v2361_v25 = vsel %vm103_vm1, %v962_v18, %v2343_v19 }
 0x3ee   :  { %1004 = vrot.lane.b32.xlu1 %v2346_v20, %s1837_s19  ;;  %1006 = vrot.lane.b32.xlu0 %v2350_v22, %s1837_s19 }
 0x3f0   :  { %v989_v31 = vpop.permute.xlu0 %988  ;;  %v991_v57 = vpop.permute.xlu1 %990 }
 0x3f1   :  { %v1023_v27 = vsel %vm161_vm2, %v989_v31, %v991_v57 }
 0x3f2   :  { %1016 = vrot.lane.b32.xlu1 %v2357_v1, %s1837_s19  ;;  %1018 = vrot.lane.b32.xlu0 %v2361_v25, %s1837_s19 }
 0x3f3   :  { %1058 = vmatprep.subr.bf16.mxu1 %v1023_v27 }
 0x3f4   :  { %v987_v29 = vpop.permute.xlu0 %986 }
 0x3f5   :  { %v1022_v30 = vsel %vm161_vm2, %v987_v29, %v989_v31  ;;  %v1826_v31 = vld [vmem:[%s2626_s5 + $0x10] sm:$0xff]  }
 0x3f6   :  { %996 = vrot.lane.b32.xlu1 %v2291_v59, %s1837_s19  ;;  %1008 = vrot.lane.b32.xlu0 %v2337_v17, %s1837_s19 }
 0x3f7   :  { %1059 = vmatpush1.bf16.msra.mxu1 %v1022_v30 }
 0x3fa   :  { %1334 = vrot.lane.b32.xlu0 %v2255_v48, %s1839_s0  ;;  %1020 = vrot.lane.b32.xlu1 %v2343_v19, %s1837_s19 }
 0x3fe   :  { %1332 = vrot.lane.b32.xlu0 %v2269_v53, %s1839_s0  ;;  %1336 = vrot.lane.b32.xlu1 %v2260_v2, %s1839_s0 }
 0x402   :  { %1348 = vrot.lane.b32.xlu0 %v2313_v9, %s1839_s0  ;;  %1346 = vrot.lane.b32.xlu1 %v2308_v28, %s1839_s0 }
 0x406   :  { %1358 = vrot.lane.b32.xlu0 %v2323_v4, %s1839_s0  ;;  %1344 = vrot.lane.b32.xlu1 %v2316_v0, %s1839_s0 }
 0x40a   :  { %1356 = vrot.lane.b32.xlu0 %v2331_v15, %s1839_s0  ;;  %1360 = vrot.lane.b32.xlu1 %v2328_v14, %s1839_s0 }
 0x40e   :  { %1340 = vrot.lane.b32.xlu0 %v2287_v58, %s1839_s0  ;;  %1338 = vrot.lane.b32.xlu1 %v2265_v52, %s1839_s0 }
 0x412   :  { %1352 = vrot.lane.b32.xlu0 %v2350_v22, %s1839_s0  ;;  %1350 = vrot.lane.b32.xlu1 %v2346_v20, %s1839_s0 }
 0x416   :  { %1364 = vrot.lane.b32.xlu0 %v2361_v25, %s1839_s0  ;;  %1362 = vrot.lane.b32.xlu1 %v2357_v1, %s1839_s0 }
 0x41a   :  { %1354 = vrot.lane.b32.xlu0 %v2337_v17, %s1839_s0  ;;  %1342 = vrot.lane.b32.xlu1 %v2291_v59, %s1839_s0 }
 0x41e   :  { %1366 = vrot.lane.b32.xlu1 %v2343_v19, %s1839_s0 }
 0x422   :  { %1643 = vperm.xlu1 %1810, %v1639_v32  }
 0x44c   :  { %v1001_v33 = vpop.permute.xlu1 %1000 }
 0x450   :  { %v1003_v35 = vpop.permute.xlu0 %1002  ;;  %v999_v43 = vpop.permute.xlu1 %998 }
 0x451   :  { %v1028_v45 = vsel %vm161_vm2, %v1001_v33, %v1003_v35  ;;  %v1027_v63 = vsel %vm161_vm2, %v999_v43, %v1001_v33 }
 0x452   :  { %1060 = vmatprep.subr.bf16.mxu1 %v1028_v45 }
 0x453   :  { %1061 = vmatpush1.bf16.msra.mxu1 %v1027_v63 }
 0x454   :  { %v1013_v34 = vpop.permute.xlu0 %1012 }
 0x458   :  { %v1011_v7 = vpop.permute.xlu0 %1010  ;;  %v1015_v36 = vpop.permute.xlu1 %1014 }
 0x459   :  { %v1033_v24 = vsel %vm161_vm2, %v1013_v34, %v1015_v36  ;;  %v1032_v37 = vsel %vm161_vm2, %v1011_v7, %v1013_v34 }
 0x45a   :  { %1062 = vmatprep.subr.bf16.mxu1 %v1033_v24 }
 0x45b   :  { %1063 = vmatpush1.bf16.msra.mxu1 %v1032_v37 }
 0x45c   :  { %v995_v39 = vpop.permute.xlu0 %994  ;;  %v993_v40 = vpop.permute.xlu1 %992 }
 0x45d   :  { %v1024_v38 = vsel %vm161_vm2, %v991_v57, %v993_v40  ;;  %v1025_v47 = vsel %vm161_vm2, %v993_v40, %v995_v39 }
 0x45e   :  { %1101 = vmatprep.subr.bf16.mxu1 %v1025_v47  ;;  %1740 = vmatmul.mubr.msk.bf16.vlgmr.msra.gmra.mrb[0].mxu1 %vm195_vm3, %v1824_v26 }
 0x45f   :  { %1102 = vmatpush1.bf16.msra.mxu1 %v1024_v38  ;;  %1133 = vmatprep.mubr.bf16.mxu1 %v1838_v12 }
 0x460   :  { %v1007_v44 = vpop.permute.xlu0 %1006  ;;  %v1005_v50 = vpop.permute.xlu1 %1004 }
 0x461   :  { %v1029_v49 = vsel %vm161_vm2, %v1003_v35, %v1005_v50  ;;  %v1030_v51 = vsel %vm161_vm2, %v1005_v50, %v1007_v44 }
 0x462   :  { %1103 = vmatprep.subr.bf16.mxu1 %v1030_v51 }
 0x463   :  { %1104 = vmatpush1.bf16.msra.mxu1 %v1029_v49 }
 0x464   :  { %v1019_v53 = vpop.permute.xlu0 %1018  ;;  %v1017_v54 = vpop.permute.xlu1 %1016 }
 0x465   :  { %v1034_v55 = vsel %vm161_vm2, %v1015_v36, %v1017_v54  ;;  %v1035_v59 = vsel %vm161_vm2, %v1017_v54, %v1019_v53 }
 0x466   :  { %1105 = vmatprep.subr.bf16.mxu1 %v1035_v59 }
 0x467   :  { %1106 = vmatpush1.bf16.msra.mxu1 %v1034_v55 }
 0x468   :  { %v997_v60 = vpop.permute.xlu1 %996  ;;  %v1009_v6 = vpop.permute.xlu0 %1008 }
 0x469   :  { %v1026_v3 = vsel %vm161_vm2, %v995_v39, %v997_v60  ;;  %1144 = vmatprep.subr.bf16.mxu1 %v997_v60  ;;  %v1031_v8 = vsel %vm161_vm2, %v1007_v44, %v1009_v6 }
 0x46a   :  { %1741 = vmatmul.mubr.msk.bf16.vlgmr.msra.gmra.mrb[4].mxu1 %vm195_vm3, %v1824_v26 }
 0x46b   :  { %1145 = vmatpush1.bf16.msra.mxu1 %v1026_v3  ;;  %1176 = vmatprep.mubr.bf16.mxu1 %v1838_v12 }
 0x46c   :  { %1146 = vmatprep.subr.bf16.mxu1 %v1009_v6  ;;  %v1021_v10 = vpop.permute.xlu1 %1020  ;;  %v1335_v5 = vpop.permute.xlu0 %1334 }
 0x46d   :  { %v1036_v11 = vsel %vm161_vm2, %v1019_v53, %v1021_v10 }
 0x46f   :  { %1147 = vmatpush1.bf16.msra.mxu1 %v1031_v8 }
 0x470   :  { %1148 = vmatprep.subr.bf16.mxu1 %v1021_v10 }
 0x473   :  { %1149 = vmatpush1.bf16.msra.mxu1 %v1036_v11 }
 0x474   :  { %1195 = vmatprep.subr.bf16.mxu1 %v2255_v48  ;;  %v1337_v48 = vpop.permute.xlu1 %1336 }
 0x476   :  { %1742 = vmatmul.mubr.msk.bf16.vlgmr.msra.gmra.mrb[8].mxu1 %vm195_vm3, %v1824_v26 }
 0x477   :  { %1745 = vmatpush1.bf16.msk.msra.mxu1 %vm1744_vm8, %v2251_v46  ;;  %1227 = vmatprep.mubr.bf16.mxu1 %v1838_v12  ;;  %v1333_v46 = vpop.permute.xlu0 %1332 }
 0x478   :  { %1197 = vmatprep.subr.bf16.mxu1 %v2308_v28 }
 0x47b   :  { %1198 = vmatpush1.bf16.msra.mxu1 %v2316_v0  ;;  %v1349_v28 = vpop.permute.xlu0 %1348  ;;  %v1347_v0 = vpop.permute.xlu1 %1346 }
 0x47c   :  { %1199 = vmatprep.subr.bf16.mxu1 %v2323_v4 }
 0x47f   :  { %1200 = vmatpush1.bf16.msra.mxu1 %v2331_v15 }
 0x480   :  { %1238 = vmatprep.subr.bf16.mxu1 %v2265_v52  ;;  %v1345_v52 = vpop.permute.xlu1 %1344 }
 0x482   :  { %1746 = vmatmul.mubr.msk.bf16.vlgmr.msra.gmra.mrb[0].mxu1 %vm195_vm3, %v1825_v13 }
 0x483   :  { %1239 = vmatpush1.bf16.msra.mxu1 %v2260_v2  ;;  %1270 = vmatprep.mubr.bf16.mxu1 %v1838_v12  ;;  %v1359_v2 = vpop.permute.xlu0 %1358 }
 0x484   :  { %1240 = vmatprep.subr.bf16.mxu1 %v2346_v20  ;;  %v1361_v4 = vpop.permute.xlu1 %1360 }
 0x485   :  { %v1379_v18 = vsel %vm509_vm4, %v1359_v2, %v1361_v4 }
 0x487   :  { %1241 = vmatpush1.bf16.msra.mxu1 %v2313_v9  ;;  %v1357_v9 = vpop.permute.xlu0 %1356 }
 0x488   :  { %1242 = vmatprep.subr.bf16.mxu1 %v2357_v1  ;;  %v1339_v16 = vpop.permute.xlu1 %1338 }
 0x489   :  { %v1370_v1 = vsel %vm509_vm4, %v1337_v48, %v1339_v16 }
 0x48b   :  { %1243 = vmatpush1.bf16.msra.mxu1 %v2328_v14  ;;  %v1368_v14 = vsel %vm509_vm4, %v1333_v46, %v1335_v5  ;;  %v1341_v15 = vpop.permute.xlu0 %1340 }
 0x48c   :  { %1748 = vmatprep.subr.msk.bf16.mxu1 %vm924_vm7, %v2280_v56  ;;  %v1369_v56 = vsel %vm509_vm4, %v1335_v5, %v1337_v48  ;;  %v1371_v57 = vsel %vm509_vm4, %v1339_v16, %v1341_v15 }
 0x48e   :  { %1747 = vmatmul.mubr.msk.bf16.vlgmr.msra.gmra.mrb[4].mxu1 %vm195_vm3, %v1825_v13 }
 0x48f   :  { %1282 = vmatpush1.bf16.msra.mxu1 %v2287_v58  ;;  %1313 = vmatprep.mubr.bf16.mxu1 %v1838_v12  ;;  %v1374_v58 = vsel %vm509_vm4, %v1347_v0, %v1349_v28  ;;  %v1353_v20 = vpop.permute.xlu0 %1352 }
 0x490   :  { %1283 = vmatprep.subr.bf16.mxu1 %v2337_v17  ;;  %v1373_v17 = vsel %vm509_vm4, %v1345_v52, %v1347_v0 }
 0x493   :  { %1284 = vmatpush1.bf16.msra.mxu1 %v2350_v22  ;;  %v1351_v22 = vpop.permute.xlu1 %1350  ;;  %v1365_v27 = vpop.permute.xlu0 %1364 }
 0x494   :  { %1285 = vmatprep.subr.bf16.mxu1 %v2343_v19  ;;  %v1378_v19 = vsel %vm509_vm4, %v1357_v9, %v1359_v2  ;;  %v1375_v30 = vsel %vm509_vm4, %v1349_v28, %v1351_v22 }
 0x497   :  { %1286 = vmatpush1.bf16.msra.mxu1 %v2361_v25  ;;  %v1376_v25 = vsel %vm509_vm4, %v1351_v22, %v1353_v20  ;;  %v1363_v29 = vpop.permute.xlu1 %1362  ;;  %v1355_v45 = vpop.permute.xlu0 %1354 }
 0x498   :  { %1404 = vmatprep.subr.bf16.mxu1 %v1369_v56  ;;  %v1381_v32 = vsel %vm509_vm4, %v1363_v29, %v1365_v27  ;;  %v1380_v33 = vsel %vm509_vm4, %v1361_v4, %v1363_v29  ;;  %v1377_v63 = vsel %vm509_vm4, %v1353_v20, %v1355_v45 }
 0x49a   :  { %1749 = vmatmul.mubr.msk.bf16.vlgmr.msra.gmra.mrb[8].mxu1 %vm195_vm3, %v1825_v13 }
 0x49b   :  { %1405 = vmatpush1.bf16.msra.mxu1 %v1368_v14  ;;  %1436 = vmatprep.mubr.bf16.mxu1 %v1838_v12  ;;  %v1343_v35 = vpop.permute.xlu1 %1342 }
 0x49c   :  { %1406 = vmatprep.subr.bf16.mxu1 %v1374_v58  ;;  %v1372_v43 = vsel %vm509_vm4, %v1341_v15, %v1343_v35 }
 0x49f   :  { %1407 = vmatpush1.bf16.msra.mxu1 %v1373_v17  ;;  %v1367_v34 = vpop.permute.xlu1 %1366 }
 0x4a0   :  { %1408 = vmatprep.subr.bf16.mxu1 %v1379_v18  ;;  %v1382_v7 = vsel %vm509_vm4, %v1365_v27, %v1367_v34 }
 0x4a3   :  { %1409 = vmatpush1.bf16.msra.mxu1 %v1378_v19 }
 0x4a4   :  { %1447 = vmatprep.subr.bf16.mxu1 %v1371_v57 }
 0x4a6   :  { %1753 = vmatmul.mubr.msk.bf16.vlgmr.msra.gmra.mrb[0].mxu1 %vm195_vm3, %v1826_v31 }
 0x4a7   :  { %1448 = vmatpush1.bf16.msra.mxu1 %v1370_v1  ;;  %1479 = vmatprep.mubr.bf16.mxu1 %v1838_v12 }
 0x4a8   :  { %1449 = vmatprep.subr.bf16.mxu1 %v1376_v25 }
 0x4ab   :  { %1450 = vmatpush1.bf16.msra.mxu1 %v1375_v30 }
 0x4ac   :  { %1451 = vmatprep.subr.bf16.mxu1 %v1381_v32 }
 0x4af   :  { %1452 = vmatpush1.bf16.msra.mxu1 %v1380_v33 }
 0x4b0   :  { %1490 = vmatprep.subr.bf16.mxu1 %v1343_v35 }
 0x4b2   :  { %1754 = vmatmul.mubr.msk.bf16.vlgmr.msra.gmra.mrb[4].mxu1 %vm195_vm3, %v1826_v31 }
 0x4b3   :  { %1491 = vmatpush1.bf16.msra.mxu1 %v1372_v43  ;;  %1522 = vmatprep.mubr.bf16.mxu1 %v1838_v12 }
 0x4b4   :  { %1492 = vmatprep.subr.bf16.mxu1 %v1355_v45  ;;  %v1663_v45 = vld [vmem:[%s2628_s7] sm:$0xff] }
 0x4b7   :  { %1493 = vmatpush1.bf16.msra.mxu1 %v1377_v63  ;;  %v1664_v63 = vld [vmem:[%s2628_s7 + $0x8] sm:$0xff] }
 0x4b8   :  { %1494 = vmatprep.subr.bf16.mxu1 %v1367_v34  ;;  %v1640_v34 = vld [vmem:[%s2627_s6 + $0x8] sm:$0xff] }
 0x4bb   :  { %1495 = vmatpush1.bf16.msra.mxu1 %v1382_v7  ;;  %v1644_v7 = vpop.permute.xlu1 %1643 }
 0x4be   :  { %1755 = vmatmul.mubr.msk.bf16.vlgmr.msra.gmra.mrb[8].mxu1 %vm195_vm3, %v1826_v31 }
 0x579   :  { %v2488_v36 = vpop.f32.mrb[0].mxu1 }
 0x57a   :  { %v1545_v24 = vmul.f32 %v2488_v36, %v2132_v41  ;;  %v2492_v37 = vpop.f32.mrb[1].mxu1 }
 0x57b   :  { %v1546_v12 = vmul.f32 %v2492_v37, %v2134_v42  ;;  %v2496_v26 = vpop.f32.mrb[2].mxu1 }
 0x57c   :  { %v1575_v39 = vmul.f32 %v1545_v24, %v2488_v36  ;;  %v1551_v40 = vmul.f32 %v2496_v26, %v2132_v41  ;;  %v2501_v38 = vpop.f32.mrb[3].mxu1 }
 0x57d   :  { %v1557_v47 = vadd.f32 %v1546_v12, %v1545_v24  ;;  %v1576_v44 = vmul.f32 %v1546_v12, %v2492_v37  ;;  %v1552_v50 = vmul.f32 %v2501_v38, %v2134_v42 }
 0x57e   :  { %v1581_v49 = vmul.f32 %v1551_v40, %v2496_v26 }
 0x57f   :  { %v1587_v51 = vadd.f32 %v1576_v44, %v1575_v39  ;;  %v1565_v53 = vadd.f32 %v1552_v50, %v1551_v40  ;;  %v1582_v54 = vmul.f32 %v1552_v50, %v2501_v38 }
 0x581   :  { %v1595_v55 = vadd.f32 %v1582_v54, %v1581_v49 }
 0x585   :  { %v2508_v59 = vpop.f32.mrb[4].mxu1 }
 0x586   :  { %v1547_v41 = vmul.f32 %v2508_v59, %v2156_v61  ;;  %v2512_v60 = vpop.f32.mrb[5].mxu1 }
 0x587   :  { %v1548_v3 = vmul.f32 %v2512_v60, %v2158_v62  ;;  %v2516_v6 = vpop.f32.mrb[6].mxu1 }
 0x588   :  { %v1558_v42 = vadd.f32 %v1557_v47, %v1547_v41  ;;  %v1577_v8 = vmul.f32 %v1547_v41, %v2508_v59  ;;  %v1553_v10 = vmul.f32 %v2516_v6, %v2156_v61  ;;  %v2521_v11 = vpop.f32.mrb[7].mxu1 }
 0x589   :  { %v1578_v5 = vmul.f32 %v1548_v3, %v2512_v60  ;;  %v1554_v13 = vmul.f32 %v2521_v11, %v2158_v62 }
 0x58a   :  { %v1588_v46 = vadd.f32 %v1587_v51, %v1577_v8  ;;  %v1559_v48 = vadd.f32 %v1558_v42, %v1548_v3  ;;  %v1566_v28 = vadd.f32 %v1565_v53, %v1553_v10  ;;  %v1583_v0 = vmul.f32 %v1553_v10, %v2516_v6 }
 0x58b   :  { %v1584_v2 = vmul.f32 %v1554_v13, %v2521_v11 }
 0x58c   :  { %v1589_v52 = vadd.f32 %v1588_v46, %v1578_v5  ;;  %v1596_v9 = vadd.f32 %v1595_v55, %v1583_v0  ;;  %v1567_v4 = vadd.f32 %v1566_v28, %v1554_v13 }
 0x58e   :  { %v1597_v56 = vadd.f32 %v1596_v9, %v1584_v2 }
 0x591   :  { %v2528_v14 = vpop.f32.mrb[8].mxu1 }
 0x592   :  { %v1549_v61 = vmul.f32 %v2528_v14, %v2180_v21  ;;  %v2532_v58 = vpop.f32.mrb[9].mxu1 }
 0x593   :  { %v1550_v62 = vmul.f32 %v2532_v58, %v2182_v23  ;;  %v2536_v15 = vpop.f32.mrb[10].mxu1 }
 0x594   :  { %v1560_v16 = vadd.f32 %v1559_v48, %v1549_v61  ;;  %v1579_v17 = vmul.f32 %v1549_v61, %v2528_v14  ;;  %v1555_v18 = vmul.f32 %v2536_v15, %v2180_v21  ;;  %v2541_v19 = vpop.f32.mrb[11].mxu1 }
 0x595   :  { %v1580_v20 = vmul.f32 %v1550_v62, %v2532_v58  ;;  %v1556_v22 = vmul.f32 %v2541_v19, %v2182_v23  ;;  %v1561_v31 = vsel %vm734_vm5, %v1550_v62, 0.0 }
 0x596   :  { %v1590_v57 = vadd.f32 %v1589_v52, %v1579_v17  ;;  %v1568_v1 = vadd.f32 %v1567_v4, %v1555_v18  ;;  %v1585_v25 = vmul.f32 %v1555_v18, %v2536_v15  ;;  %v1562_v27 = vadd.f32 %v1561_v31, %v1560_v16 }
 0x597   :  { %v1569_v29 = vsel %vm734_vm5, %v1556_v22, 0.0  ;;  %v1586_v30 = vmul.f32 %v1556_v22, %v2541_v19  ;;  %v1591_v21 = vsel %vm734_vm5, %v1580_v20, 0.0 }
 0x598   :  { %v1598_v32 = vadd.f32 %v1597_v56, %v1585_v25  ;;  %1563 = vadd.xlane.f32.xlu0 %v1562_v27  ;;  %v1570_v33 = vadd.f32 %v1569_v29, %v1568_v1  ;;  %v1592_v35 = vadd.f32 %v1591_v21, %v1590_v57 }
 0x599   :  { %v1599_v43 = vsel %vm734_vm5, %v1586_v30, 0.0 }
 0x59a   :  { %1571 = vadd.xlane.f32.xlu1 %v1570_v33  ;;  %v1600_v23 = vadd.f32 %v1599_v43, %v1598_v32 }
 0x59c   :  { %1593 = vadd.xlane.f32.xlu0 %v1592_v35 }
 0x5a0   :  { %1601 = vadd.xlane.f32.xlu0 %v1600_v23 }
 0x5ab   :  { %1667 = vperm.xlu1 %1810, %v1663_v45  }
 0x5af   :  { %1672 = vperm.xlu1 %1810, %v1664_v63  }
 0x5b6   :  { %1648 = vperm.xlu0 %1811, %v1640_v34  }
 0x625   :  { %v1564_v24 = vpop.xlane.xlu0 %1563 }
 0x626   :  { %v1573_v12 = vmul.f32 0.001953125, %v1564_v24 }
 0x627   :  { %v1572_v39 = vpop.xlane.xlu1 %1571 }
 0x628   :  { %v2561_v47 = vmul.f32 0.001953125, %v1572_v39  ;;  %v1605_v44 = vmul.f32 %v1573_v12, %v1573_v12  ;;  %v1611_v10 = vsub.f32 %v2488_v36, %v1573_v12  ;;  %v1612_v5 = vsub.f32 %v2492_v37, %v1573_v12 }
 0x629   :  { %v1594_v40 = vpop.xlane.xlu0 %1593  ;;  %v1613_v13 = vsub.f32 %v2508_v59, %v1573_v12  ;;  %v1614_v46 = vsub.f32 %v2512_v60, %v1573_v12  ;;  %v1615_v28 = vsub.f32 %v2528_v14, %v1573_v12  ;;  %v1616_v0 = vsub.f32 %v2532_v58, %v1573_v12 }
 0x62a   :  { %v1603_v50 = vmul.f32 0.001953125, %v1594_v40  ;;  %v1606_v55 = vmul.f32 %v2561_v47, %v2561_v47  ;;  %v1617_v2 = vsub.f32 %v2496_v26, %v2561_v47  ;;  %v1618_v52 = vsub.f32 %v2501_v38, %v2561_v47 }
 0x62b   :  { %v1619_v59 = vsub.f32 %v2516_v6, %v2561_v47  ;;  %v1620_v60 = vsub.f32 %v2521_v11, %v2561_v47  ;;  %v1668_v38 = vpop.permute.xlu1 %1667  ;;  %v1621_v20 = vsub.f32 %v2536_v15, %v2561_v47  ;;  %v1622_v22 = vsub.f32 %v2541_v19, %v2561_v47 }
 0x62c   :  { %v1607_v49 = vsub.f32 %v1603_v50, %v1605_v44 }
 0x62d   :  { %v1602_v51 = vpop.xlane.xlu0 %1601 }
 0x62e   :  { %v1609_v53 = vmax.f32 %v1607_v49, 0.0  ;;  %v1604_v54 = vmul.f32 0.001953125, %v1602_v51 }
 0x62f   :  { %v1673_v24 = vpop.permute.xlu1 %1672 }
 0x630   :  { %v1623_v41 = vadd.f32 1e-05, %v1609_v53  ;;  %v1608_v3 = vsub.f32 %v1604_v54, %v1606_v55 }
 0x632   :  { %1831 = vrsqrt.f32 %v1623_v41  ;;  %v1610_v42 = vmax.f32 %v1608_v3, 0.0 }
 0x634   :  { %v1624_v8 = vadd.f32 1e-05, %v1610_v42 }
 0x635   :  { %v1649_v23 = vpop.permute.xlu0 %1648 }
 0x636   :  { %1833 = vrsqrt.f32 %v1624_v8 }
 0x63c   :  { %v1832_v48 = vpop.eup %1831 }
 0x63d   :  { %v1627_v9 = vmul.f32 %v1832_v48, %v1611_v10  ;;  %v1628_v4 = vmul.f32 %v1832_v48, %v1612_v5  ;;  %v1629_v36 = vmul.f32 %v1832_v48, %v1613_v13  ;;  %v1630_v56 = vmul.f32 %v1832_v48, %v1614_v46 }
 0x63e   :  { %v1631_v37 = vmul.f32 %v1832_v48, %v1615_v28  ;;  %v1632_v61 = vmul.f32 %v1832_v48, %v1616_v0 }
 0x63f   :  { %v1651_v14 = vmul.f32 %v1644_v7, %v1627_v9  ;;  %v1652_v58 = vmul.f32 %v1644_v7, %v1628_v4  ;;  %v1653_v62 = vmul.f32 %v1644_v7, %v1629_v36  ;;  %v1654_v16 = vmul.f32 %v1644_v7, %v1630_v56 }
 0x640   :  { %v1834_v26 = vpop.eup %1833  ;;  %v1655_v17 = vmul.f32 %v1644_v7, %v1631_v37  ;;  %v1656_v18 = vmul.f32 %v1644_v7, %v1632_v61 }
 0x641   :  { %v1675_v31 = vadd.f32 %v1668_v38, %v1651_v14  ;;  %v1676_v57 = vadd.f32 %v1668_v38, %v1652_v58  ;;  %v1677_v6 = vadd.f32 %v1668_v38, %v1653_v62  ;;  %v1678_v1 = vadd.f32 %v1668_v38, %v1654_v16 }
 0x642   :  { %v1679_v25 = vadd.f32 %v1668_v38, %v1655_v17  ;;  %v1680_v11 = vadd.f32 %v1668_v38, %v1656_v18  ;;  %v1633_v27 = vmul.f32 %v1834_v26, %v1617_v2  ;;  %v1634_v29 = vmul.f32 %v1834_v26, %v1618_v52 }
 0x643   :  { %v1687_v30 = vmax.f32 %v1675_v31, 0.0  ;;  %v1688_v21 = vmax.f32 %v1676_v57, 0.0  ;;  %v1689_v32 = vmax.f32 %v1677_v6, 0.0  ;;  %v1690_v33 = vmax.f32 %v1678_v1, 0.0 }
 0x644   :  { %v1691_v35 = vmax.f32 %v1679_v25, 0.0  ;;  %v1692_v43 = vmax.f32 %v1680_v11, 0.0  ;;  %v1635_v45 = vmul.f32 %v1834_v26, %v1619_v59  ;;  %v1636_v15 = vmul.f32 %v1834_v26, %v1620_v60 }
 0x645   :  { %1699 = vst [vmem:[%s2629_s8] sm:$0xff] %v1687_v30  ;;  %1700 = vst [vmem:[%s2629_s8 + $0x8] sm:$0xff] %v1688_v21  ;;  %v1637_v19 = vmul.f32 %v1834_v26, %v1621_v20  ;;  %v1638_v63 = vmul.f32 %v1834_v26, %v1622_v22  ;;  %v1657_v34 = vmul.f32 %v1649_v23, %v1633_v27 }
 0x646   :  { %1701 = vst [vmem:[%s2629_s8 + $0x10] sm:$0xff] %v1689_v32  ;;  %1702 = vst [vmem:[%s2629_s8 + $0x18] sm:$0xff] %v1690_v33  ;;  %v1658_v7 = vmul.f32 %v1649_v23, %v1634_v29  ;;  %v1659_v12 = vmul.f32 %v1649_v23, %v1635_v45  ;;  %v1660_v39 = vmul.f32 %v1649_v23, %v1636_v15 }
 0x647   :  { %1703 = vst [vmem:[%s2629_s8 + $0x20] sm:$0xff] %v1691_v35  ;;  %1704 = vst.msk [vmem:[%s2629_s8 + $0x28] sm:$0xff] %vm734_vm5, %v1692_v43  ;;  %v1661_v40 = vmul.f32 %v1649_v23, %v1637_v19  ;;  %v1662_v47 = vmul.f32 %v1649_v23, %v1638_v63  ;;  %v1681_v44 = vadd.f32 %v1673_v24, %v1657_v34 }
 0x648   :  { %v1682_v50 = vadd.f32 %v1673_v24, %v1658_v7  ;;  %v1683_v49 = vadd.f32 %v1673_v24, %v1659_v12  ;;  %v1684_v51 = vadd.f32 %v1673_v24, %v1660_v39 }
 0x649   :  { %v1685_v53 = vadd.f32 %v1673_v24, %v1661_v40  ;;  %v1686_v54 = vadd.f32 %v1673_v24, %v1662_v47  ;;  %v1693_v55 = vmax.f32 %v1681_v44, 0.0 }
 0x64a   :  { %v1694_v41 = vmax.f32 %v1682_v50, 0.0  ;;  %v1695_v3 = vmax.f32 %v1683_v49, 0.0  ;;  %v1696_v42 = vmax.f32 %v1684_v51, 0.0 }
 0x64b   :  { %v1697_v8 = vmax.f32 %v1685_v53, 0.0  ;;  %v1698_v10 = vmax.f32 %v1686_v54, 0.0  ;;  %1705 = vst [vmem:[%s2629_s8 + $0x30] sm:$0xff] %v1693_v55 }
 0x64c   :  { %1706 = vst [vmem:[%s2629_s8 + $0x38] sm:$0xff] %v1694_v41  ;;  %1707 = vst [vmem:[%s2629_s8 + $0x40] sm:$0xff] %v1695_v3 }
 0x64d   :  { %1708 = vst [vmem:[%s2629_s8 + $0x48] sm:$0xff] %v1696_v42  ;;  %1709 = vst [vmem:[%s2629_s8 + $0x50] sm:$0xff] %v1697_v8 }
 0x64e   :  { %1710 = vst.msk [vmem:[%s2629_s8 + $0x58] sm:$0xff] %vm734_vm5, %v1698_v10 }

</bundles_post_ra>
